<compile_context>
chip_gen: v7x
topology: tpu7x:2x2x1
jax: 0.10.0
libtpu: 0.0.40
codegen_flags: <defaults>
</compile_context>

<pallas_src>
import math
import jax
import jax.numpy as jnp
from jax.experimental import pallas as pl
from jax.experimental.pallas import tpu as pltpu

# ---------------- small synthetic BERT config (stand-in for bert-large-portuguese) ------
VOCAB = 128
TYPE_VOCAB = 2
MAX_POS = 64
B = 2              # batch
S = 8              # seq len (max_len analog)
H = 32             # hidden size
NUM_HEADS = 4
HEAD_DIM = H // NUM_HEADS
INTER = 64         # intermediate (FFN) size
NUM_LAYERS = 2
NUM_CLASSES = 3
CLS_PAD = 128      # classifier head lane-padded to a full 128-lane tile
LN_EPS = 1e-12


def _gelu(x):
    # TODO(synk): HF BERT uses erf-based GELU; tanh approximation used here
    # (erf is not guaranteed to lower in Mosaic).
    return 0.5 * x * (1.0 + jnp.tanh(0.7978845608028654 * (x + 0.044715 * x * x * x)))


def _layernorm(x, g, b):
    mu = jnp.mean(x, axis=-1, keepdims=True)
    var = jnp.mean((x - mu) ** 2, axis=-1, keepdims=True)
    return (x - mu) * jax.lax.rsqrt(var + LN_EPS) * g + b


def _bf16(x):
    return x.astype(jnp.bfloat16)


# ---------------- fused kernel: one grid step == one full sequence through all layers ---

def fused_bert_kernel(emb_ref, mask_ref, embg_ref, embb_ref,
                      wq_ref, wk_ref, wv_ref, bq_ref, bk_ref, bv_ref,
                      wo_ref, bo_ref, ln1g_ref, ln1b_ref,
                      w1_ref, b1_ref, w2_ref, b2_ref, ln2g_ref, ln2b_ref,
                      poolw_ref, poolb_ref, clsw_ref, clsb_ref,
                      out_ref):
    mask_add = mask_ref[...]                                    # (1, S) additive key mask

    # BERT embedding LayerNorm (embedding gathers happen in the wrapper).
    x0 = _layernorm(emb_ref[...], embg_ref[...], embb_ref[...])  # (S, H) f32

    def layer_body(l, x):
        xh = jnp.broadcast_to(_bf16(x)[None], (NUM_HEADS, S, H))   # (NH, S, H)

        # Per-head projections as batched matmuls (heads on the leading axis).
        # 1/sqrt(head_dim) is already folded into wq/bq.
        q = jnp.einsum('hsd,hde->hse', xh, wq_ref[l],
                       preferred_element_type=jnp.float32) + bq_ref[l]   # (NH, S, HD)
        k = jnp.einsum('hsd,hde->hse', xh, wk_ref[l],
                       preferred_element_type=jnp.float32) + bk_ref[l]
        v = jnp.einsum('hsd,hde->hse', xh, wv_ref[l],
                       preferred_element_type=jnp.float32) + bv_ref[l]

        scores = jnp.einsum('hqd,hkd->hqk', _bf16(q), _bf16(k),
                            preferred_element_type=jnp.float32)          # (NH, S, S)
        scores = scores + mask_add                      # (1,S) key-padding mask broadcast
        scores = scores - jnp.max(scores, axis=-1, keepdims=True)
        p = jnp.exp(scores)
        p = p * pl.reciprocal(jnp.sum(p, axis=-1, keepdims=True), approx=True)

        ctx = jnp.einsum('hqk,hkd->hqd', _bf16(p), _bf16(v),
                         preferred_element_type=jnp.float32)             # (NH, S, HD)

        # Output projection: per-head batched matmul then sum over heads
        # == concat(heads) @ W_O, without any lane concat/relayout.
        attn = jnp.sum(jnp.einsum('hsd,hdo->hso', _bf16(ctx), wo_ref[l],
                                  preferred_element_type=jnp.float32),
                       axis=0) + bo_ref[l]                               # (S, H)

        x1 = _layernorm(x + attn, ln1g_ref[l], ln1b_ref[l])

        # feed-forward
        hff = _gelu(jnp.dot(_bf16(x1), w1_ref[l],
                            preferred_element_type=jnp.float32) + b1_ref[l])
        ff = jnp.dot(_bf16(hff), w2_ref[l],
                     preferred_element_type=jnp.float32) + b2_ref[l]
        return _layernorm(x1 + ff, ln2g_ref[l], ln2b_ref[l])

    x = jax.lax.fori_loop(0, NUM_LAYERS, layer_body, x0, unroll=True)

    # Pooler (dense + tanh) on the [CLS] token = row 0 of this sequence,
    # dropout == identity at inference, then the lane-padded linear classifier head.
    cls = x[0:1, :]                                                      # (1, H)
    pooled = jnp.tanh(jnp.dot(_bf16(cls), poolw_ref[...],
                              preferred_element_type=jnp.float32) + poolb_ref[...])
    out_ref[...] = jnp.dot(_bf16(pooled), clsw_ref[...],
                           preferred_element_type=jnp.float32) + clsb_ref[...]  # (1, 128)


# ---------------- parameter init (deterministic, synthetic, head-major packed) ----------

def init_params(key):
    std = 0.02
    keys = iter(jax.random.split(key, 3 + NUM_LAYERS * 6 + 2))

    def nrm(shape):
        return (std * jax.random.normal(next(keys), shape)).astype(jnp.float32)

    scale = 1.0 / math.sqrt(HEAD_DIM)

    def split_heads_in(w):   # (H, H) -> (NH, H, HD): output columns grouped per head
        return jnp.transpose(w.reshape(H, NUM_HEADS, HEAD_DIM), (1, 0, 2))

    def split_heads_out(w):  # (H, H) -> (NH, HD, H): input rows grouped per head
        return w.reshape(NUM_HEADS, HEAD_DIM, H)

    wq_l, wk_l, wv_l, bq_l, bk_l, bv_l = [], [], [], [], [], []
    wo_l, bo_l, ln1g_l, ln1b_l = [], [], [], []
    w1_l, b1_l, w2_l, b2_l, ln2g_l, ln2b_l = [], [], [], [], [], []
    for _ in range(NUM_LAYERS):
        wq, wk, wv = nrm((H, H)), nrm((H, H)), nrm((H, H))
        # fold the 1/sqrt(head_dim) scale into the Q weight & bias
        wq_l.append(split_heads_in(wq * scale))
        wk_l.append(split_heads_in(wk))
        wv_l.append(split_heads_in(wv))
        bq_l.append(jnp.zeros((NUM_HEADS, 1, HEAD_DIM), jnp.float32))
        bk_l.append(jnp.zeros((NUM_HEADS, 1, HEAD_DIM), jnp.float32))
        bv_l.append(jnp.zeros((NUM_HEADS, 1, HEAD_DIM), jnp.float32))
        wo_l.append(split_heads_out(nrm((H, H))))
        bo_l.append(jnp.zeros((1, H), jnp.float32))
        ln1g_l.append(jnp.ones((1, H), jnp.float32))
        ln1b_l.append(jnp.zeros((1, H), jnp.float32))
        w1_l.append(nrm((H, INTER)));  b1_l.append(jnp.zeros((1, INTER), jnp.float32))
        w2_l.append(nrm((INTER, H)));  b2_l.append(jnp.zeros((1, H), jnp.float32))
        ln2g_l.append(jnp.ones((1, H), jnp.float32))
        ln2b_l.append(jnp.zeros((1, H), jnp.float32))

    pool_w = nrm((H, H))
    cls_w = nrm((H, NUM_CLASSES))
    cls_w_pad = jnp.pad(cls_w, ((0, 0), (0, CLS_PAD - NUM_CLASSES)))   # lane-pad to 128

    params = {
        "word_emb": nrm((VOCAB, H)),
        "pos_emb": nrm((MAX_POS, H)),
        "type_emb": nrm((TYPE_VOCAB, H)),
        "emb_ln_g": jnp.ones((1, H), jnp.float32),
        "emb_ln_b": jnp.zeros((1, H), jnp.float32),
        # stacked per-layer, head-major weights (bf16 for the MXU), biases in f32
        "wq": jnp.stack(wq_l).astype(jnp.bfloat16),   # (L, NH, H, HD)
        "wk": jnp.stack(wk_l).astype(jnp.bfloat16),
        "wv": jnp.stack(wv_l).astype(jnp.bfloat16),
        "bq": jnp.stack(bq_l), "bk": jnp.stack(bk_l), "bv": jnp.stack(bv_l),  # (L,NH,1,HD)
        "wo": jnp.stack(wo_l).astype(jnp.bfloat16),   # (L, NH, HD, H)
        "bo": jnp.stack(bo_l),                        # (L, 1, H)
        "ln1g": jnp.stack(ln1g_l), "ln1b": jnp.stack(ln1b_l),
        "w1": jnp.stack(w1_l).astype(jnp.bfloat16),   # (L, H, INTER)
        "b1": jnp.stack(b1_l),                        # (L, 1, INTER)
        "w2": jnp.stack(w2_l).astype(jnp.bfloat16),   # (L, INTER, H)
        "b2": jnp.stack(b2_l),                        # (L, 1, H)
        "ln2g": jnp.stack(ln2g_l), "ln2b": jnp.stack(ln2b_l),
        "pool_w": pool_w.astype(jnp.bfloat16),
        "pool_b": jnp.zeros((1, H), jnp.float32),
        "cls_w": cls_w_pad.astype(jnp.bfloat16),      # (H, 128)
        "cls_b": jnp.zeros((1, CLS_PAD), jnp.float32),
    }
    return params


# ---------------- forward = SentimentClassifier.forward ---------------------------------

def sentiment_classifier_forward(input_ids, attention_mask, params):
    Bc, Sc = input_ids.shape

    # BERT embeddings (gather is glue; the LayerNorm runs inside the fused kernel).
    # TODO(synk): token_type_ids hard-coded to type 0 (single-segment inference).
    pos_ids = jnp.arange(Sc)
    emb = (params["word_emb"][input_ids]
           + params["pos_emb"][pos_ids][None, :, :]
           + params["type_emb"][0][None, None, :]).astype(jnp.float32)   # (B, S, H)

    # (B, 1, S) additive key-padding mask (padded query rows compute garbage never read).
    mask = jnp.where(attention_mask[:, None, :] > 0, 0.0, -10000.0).astype(jnp.float32)

    def const_spec(shape):
        n = len(shape)
        return pl.BlockSpec(shape, lambda b: (0,) * n)

    def batch_spec(shape):   # (B, ...) -> per-sequence block with the batch dim squeezed
        n = len(shape)
        return pl.BlockSpec((None,) + tuple(shape[1:]), lambda b: (b,) + (0,) * (n - 1))

    in_specs = [
        batch_spec((Bc, Sc, H)),                     # emb
        batch_spec((Bc, 1, Sc)),                     # additive key mask
        const_spec((1, H)), const_spec((1, H)),      # embedding LN gamma/beta
        const_spec((NUM_LAYERS, NUM_HEADS, H, HEAD_DIM)),   # wq
        const_spec((NUM_LAYERS, NUM_HEADS, H, HEAD_DIM)),   # wk
        const_spec((NUM_LAYERS, NUM_HEADS, H, HEAD_DIM)),   # wv
        const_spec((NUM_LAYERS, NUM_HEADS, 1, HEAD_DIM)),   # bq
        const_spec((NUM_LAYERS, NUM_HEADS, 1, HEAD_DIM)),   # bk
        const_spec((NUM_LAYERS, NUM_HEADS, 1, HEAD_DIM)),   # bv
        const_spec((NUM_LAYERS, NUM_HEADS, HEAD_DIM, H)),   # wo
        const_spec((NUM_LAYERS, 1, H)),                     # bo
        const_spec((NUM_LAYERS, 1, H)), const_spec((NUM_LAYERS, 1, H)),          # ln1 g/b
        const_spec((NUM_LAYERS, H, INTER)), const_spec((NUM_LAYERS, 1, INTER)),  # w1, b1
        const_spec((NUM_LAYERS, INTER, H)), const_spec((NUM_LAYERS, 1, H)),      # w2, b2
        const_spec((NUM_LAYERS, 1, H)), const_spec((NUM_LAYERS, 1, H)),          # ln2 g/b
        const_spec((H, H)), const_spec((1, H)),                                  # pooler
        const_spec((H, CLS_PAD)), const_spec((1, CLS_PAD)),                      # classifier
    ]

    out = pl.pallas_call(
        fused_bert_kernel,
        out_shape=jax.ShapeDtypeStruct((Bc, 1, CLS_PAD), jnp.float32),
        grid=(Bc,),
        in_specs=in_specs,
        out_specs=pl.BlockSpec((None, 1, CLS_PAD), lambda b: (b, 0, 0)),
        # Batch axis is independent -> "parallel" (megacore split on v7x; no-op on v5e/v6e).
        compiler_params=pltpu.CompilerParams(dimension_semantics=("parallel",)),
    )(emb, mask,
      params["emb_ln_g"], params["emb_ln_b"],
      params["wq"], params["wk"], params["wv"],
      params["bq"], params["bk"], params["bv"],
      params["wo"], params["bo"],
      params["ln1g"], params["ln1b"], params["w1"], params["b1"],
      params["w2"], params["b2"], params["ln2g"], params["ln2b"],
      params["pool_w"], params["pool_b"], params["cls_w"], params["cls_b"])

    return out.reshape(Bc, CLS_PAD)[:, :NUM_CLASSES]                     # (B, NUM_CLASSES)


if __name__ == "__main__":
    key = jax.random.PRNGKey(0)
    k_param, k_ids = jax.random.split(key)

    params = init_params(k_param)
    input_ids = jax.random.randint(k_ids, (B, S), 0, VOCAB, dtype=jnp.int32)
    attention_mask = jnp.array([[1] * S,
                                [1] * 5 + [0] * (S - 5)], dtype=jnp.int32)

    logits = sentiment_classifier_forward(input_ids, attention_mask, params)
    logits = jax.block_until_ready(logits)
    assert logits.shape == (B, NUM_CLASSES) and logits.dtype == jnp.float32
    print("KERNEL_OK")
</pallas_src>

<mosaic_0001>
module attributes {stable_mosaic.version = 11 : i64} {
  func.func @fused_bert_kernel(%arg0: i32, %arg1: memref<1x8x32xf32, #tpu.memory_space<vmem>>, %arg2: memref<1x1x8xf32, #tpu.memory_space<vmem>>, %arg3: memref<1x32xf32, #tpu.memory_space<vmem>>, %arg4: memref<1x32xf32, #tpu.memory_space<vmem>>, %arg5: memref<2x4x32x8xbf16, #tpu.memory_space<vmem>>, %arg6: memref<2x4x32x8xbf16, #tpu.memory_space<vmem>>, %arg7: memref<2x4x32x8xbf16, #tpu.memory_space<vmem>>, %arg8: memref<2x4x1x8xf32, #tpu.memory_space<vmem>>, %arg9: memref<2x4x1x8xf32, #tpu.memory_space<vmem>>, %arg10: memref<2x4x1x8xf32, #tpu.memory_space<vmem>>, %arg11: memref<2x4x8x32xbf16, #tpu.memory_space<vmem>>, %arg12: memref<2x1x32xf32, #tpu.memory_space<vmem>>, %arg13: memref<2x1x32xf32, #tpu.memory_space<vmem>>, %arg14: memref<2x1x32xf32, #tpu.memory_space<vmem>>, %arg15: memref<2x32x64xbf16, #tpu.memory_space<vmem>>, %arg16: memref<2x1x64xf32, #tpu.memory_space<vmem>>, %arg17: memref<2x64x32xbf16, #tpu.memory_space<vmem>>, %arg18: memref<2x1x32xf32, #tpu.memory_space<vmem>>, %arg19: memref<2x1x32xf32, #tpu.memory_space<vmem>>, %arg20: memref<2x1x32xf32, #tpu.memory_space<vmem>>, %arg21: memref<32x32xbf16, #tpu.memory_space<vmem>>, %arg22: memref<1x32xf32, #tpu.memory_space<vmem>>, %arg23: memref<32x128xbf16, #tpu.memory_space<vmem>>, %arg24: memref<1x128xf32, #tpu.memory_space<vmem>>, %arg25: memref<1x1x128xf32, #tpu.memory_space<vmem>>) attributes {dimension_semantics = [#tpu.dimension_semantics<parallel>], iteration_bounds = array<i64: 2>, scalar_prefetch = 0 : i64, scratch_operands = 0 : i64, tpu.core_type = #tpu.core_type<tc>, window_params = [{transform_indices = @transform_0, window_bounds = array<i64: 1, 8, 32>}, {transform_indices = @transform_1, window_bounds = array<i64: 1, 1, 8>}, {pipeline_mode = #tpu.pipeline_mode<synchronous>, transform_indices = @transform_2, window_bounds = array<i64: 1, 32>}, {pipeline_mode = #tpu.pipeline_mode<synchronous>, transform_indices = @transform_3, window_bounds = array<i64: 1, 32>}, {pipeline_mode = #tpu.pipeline_mode<synchronous>, transform_indices = @transform_4, window_bounds = array<i64: 2, 4, 32, 8>}, {pipeline_mode = #tpu.pipeline_mode<synchronous>, transform_indices = @transform_5, window_bounds = array<i64: 2, 4, 32, 8>}, {pipeline_mode = #tpu.pipeline_mode<synchronous>, transform_indices = @transform_6, window_bounds = array<i64: 2, 4, 32, 8>}, {pipeline_mode = #tpu.pipeline_mode<synchronous>, transform_indices = @transform_7, window_bounds = array<i64: 2, 4, 1, 8>}, {pipeline_mode = #tpu.pipeline_mode<synchronous>, transform_indices = @transform_8, window_bounds = array<i64: 2, 4, 1, 8>}, {pipeline_mode = #tpu.pipeline_mode<synchronous>, transform_indices = @transform_9, window_bounds = array<i64: 2, 4, 1, 8>}, {pipeline_mode = #tpu.pipeline_mode<synchronous>, transform_indices = @transform_10, window_bounds = array<i64: 2, 4, 8, 32>}, {pipeline_mode = #tpu.pipeline_mode<synchronous>, transform_indices = @transform_11, window_bounds = array<i64: 2, 1, 32>}, {pipeline_mode = #tpu.pipeline_mode<synchronous>, transform_indices = @transform_12, window_bounds = array<i64: 2, 1, 32>}, {pipeline_mode = #tpu.pipeline_mode<synchronous>, transform_indices = @transform_13, window_bounds = array<i64: 2, 1, 32>}, {pipeline_mode = #tpu.pipeline_mode<synchronous>, transform_indices = @transform_14, window_bounds = array<i64: 2, 32, 64>}, {pipeline_mode = #tpu.pipeline_mode<synchronous>, transform_indices = @transform_15, window_bounds = array<i64: 2, 1, 64>}, {pipeline_mode = #tpu.pipeline_mode<synchronous>, transform_indices = @transform_16, window_bounds = array<i64: 2, 64, 32>}, {pipeline_mode = #tpu.pipeline_mode<synchronous>, transform_indices = @transform_17, window_bounds = array<i64: 2, 1, 32>}, {pipeline_mode = #tpu.pipeline_mode<synchronous>, transform_indices = @transform_18, window_bounds = array<i64: 2, 1, 32>}, {pipeline_mode = #tpu.pipeline_mode<synchronous>, transform_indices = @transform_19, window_bounds = array<i64: 2, 1, 32>}, {pipeline_mode = #tpu.pipeline_mode<synchronous>, transform_indices = @transform_20, window_bounds = array<i64: 32, 32>}, {pipeline_mode = #tpu.pipeline_mode<synchronous>, transform_indices = @transform_21, window_bounds = array<i64: 1, 32>}, {pipeline_mode = #tpu.pipeline_mode<synchronous>, transform_indices = @transform_22, window_bounds = array<i64: 32, 128>}, {pipeline_mode = #tpu.pipeline_mode<synchronous>, transform_indices = @transform_23, window_bounds = array<i64: 1, 128>}, {transform_indices = @transform_24, window_bounds = array<i64: 1, 1, 128>}]} {
    %c0 = arith.constant 0 : index
    %c0_0 = arith.constant 0 : index
    %c0_1 = arith.constant 0 : index
    %0 = vector.load %arg2[%c0, %c0_0, %c0_1] : memref<1x1x8xf32, #tpu.memory_space<vmem>>, vector<1x1x8xf32>
    %1 = vector.shape_cast %0 : vector<1x1x8xf32> to vector<1x8xf32>
    %c0_2 = arith.constant 0 : index
    %c0_3 = arith.constant 0 : index
    %c0_4 = arith.constant 0 : index
    %2 = vector.load %arg1[%c0_2, %c0_3, %c0_4] : memref<1x8x32xf32, #tpu.memory_space<vmem>>, vector<1x8x32xf32>
    %3 = vector.shape_cast %2 : vector<1x8x32xf32> to vector<8x32xf32>
    %c0_5 = arith.constant 0 : index
    %c0_6 = arith.constant 0 : index
    %4 = vector.load %arg3[%c0_5, %c0_6] : memref<1x32xf32, #tpu.memory_space<vmem>>, vector<1x32xf32>
    %c0_7 = arith.constant 0 : index
    %c0_8 = arith.constant 0 : index
    %5 = vector.load %arg4[%c0_7, %c0_8] : memref<1x32xf32, #tpu.memory_space<vmem>>, vector<1x32xf32>
    %cst = arith.constant dense<0.000000e+00> : vector<8xf32>
    %6 = vector.multi_reduction <add>, %3, %cst [1] : vector<8x32xf32> to vector<8xf32>
    %7 = vector.shape_cast %6 : vector<8xf32> to vector<8x1xf32>
    %cst_9 = arith.constant 3.200000e+01 : f32
    %8 = vector.broadcast %cst_9 : f32 to vector<8x1xf32>
    %9 = arith.divf %7, %8 : vector<8x1xf32>
    %10 = vector.broadcast %9 : vector<8x1xf32> to vector<8x32xf32>
    %11 = arith.subf %3, %10 : vector<8x32xf32>
    %12 = arith.mulf %11, %11 : vector<8x32xf32>
    %cst_10 = arith.constant dense<0.000000e+00> : vector<8xf32>
    %13 = vector.multi_reduction <add>, %12, %cst_10 [1] : vector<8x32xf32> to vector<8xf32>
    %14 = vector.shape_cast %13 : vector<8xf32> to vector<8x1xf32>
    %cst_11 = arith.constant 3.200000e+01 : f32
    %15 = vector.broadcast %cst_11 : f32 to vector<8x1xf32>
    %16 = arith.divf %14, %15 : vector<8x1xf32>
    %17 = vector.broadcast %9 : vector<8x1xf32> to vector<8x32xf32>
    %18 = arith.subf %3, %17 : vector<8x32xf32>
    %cst_12 = arith.constant 9.99999996E-13 : f32
    %19 = vector.broadcast %cst_12 : f32 to vector<8x1xf32>
    %20 = arith.addf %16, %19 : vector<8x1xf32>
    %21 = math.rsqrt %20 : vector<8x1xf32>
    %22 = vector.broadcast %21 : vector<8x1xf32> to vector<8x32xf32>
    %23 = arith.mulf %18, %22 : vector<8x32xf32>
    %24 = vector.broadcast %4 : vector<1x32xf32> to vector<8x32xf32>
    %25 = arith.mulf %23, %24 : vector<8x32xf32>
    %26 = vector.broadcast %5 : vector<1x32xf32> to vector<8x32xf32>
    %27 = arith.addf %25, %26 : vector<8x32xf32>
    %c0_i32 = arith.constant 0 : i32
    %28 = arith.truncf %27 : vector<8x32xf32> to vector<8x32xbf16>
    %29 = vector.shape_cast %28 : vector<8x32xbf16> to vector<1x8x32xbf16>
    %30 = vector.shape_cast %29 : vector<1x8x32xbf16> to vector<1x8x32xbf16>
    %31 = vector.broadcast %30 : vector<1x8x32xbf16> to vector<4x8x32xbf16>
    %32 = arith.index_cast %c0_i32 : i32 to index
    %c0_13 = arith.constant 0 : index
    %c0_14 = arith.constant 0 : index
    %c0_15 = arith.constant 0 : index
    %33 = vector.load %arg5[%32, %c0_13, %c0_14, %c0_15] : memref<2x4x32x8xbf16, #tpu.memory_space<vmem>>, vector<1x4x32x8xbf16>
    %34 = vector.shape_cast %33 : vector<1x4x32x8xbf16> to vector<4x32x8xbf16>
    "tpu.trace_start"() <{level = 10 : i32, message = "hsd,hde->hse"}> : () -> ()
    %cst_16 = arith.constant dense<0.000000e+00> : vector<4x8x8xf32>
    %35 = tpu.matmul %31, %34, %cst_16 {dimension_numbers = #tpu.dot_dimension_numbers<[2], [1], [1], [2], [0, 0, 0, 1, 1, 2], [0], [0]>} : vector<4x8x32xbf16>, vector<4x32x8xbf16>, vector<4x8x8xf32> -> vector<4x8x8xf32>
    "tpu.trace_stop"() : () -> ()
    %36 = arith.index_cast %c0_i32 : i32 to index
    %c0_17 = arith.constant 0 : index
    %c0_18 = arith.constant 0 : index
    %c0_19 = arith.constant 0 : index
    %37 = vector.load %arg8[%36, %c0_17, %c0_18, %c0_19] : memref<2x4x1x8xf32, #tpu.memory_space<vmem>>, vector<1x4x1x8xf32>
    %38 = vector.shape_cast %37 : vector<1x4x1x8xf32> to vector<4x1x8xf32>
    %39 = vector.broadcast %38 : vector<4x1x8xf32> to vector<4x8x8xf32>
    %40 = arith.addf %35, %39 : vector<4x8x8xf32>
    %41 = arith.index_cast %c0_i32 : i32 to index
    %c0_20 = arith.constant 0 : index
    %c0_21 = arith.constant 0 : index
    %c0_22 = arith.constant 0 : index
    %42 = vector.load %arg6[%41, %c0_20, %c0_21, %c0_22] : memref<2x4x32x8xbf16, #tpu.memory_space<vmem>>, vector<1x4x32x8xbf16>
    %43 = vector.shape_cast %42 : vector<1x4x32x8xbf16> to vector<4x32x8xbf16>
    "tpu.trace_start"() <{level = 10 : i32, message = "hsd,hde->hse"}> : () -> ()
    %cst_23 = arith.constant dense<0.000000e+00> : vector<4x8x8xf32>
    %44 = tpu.matmul %31, %43, %cst_23 {dimension_numbers = #tpu.dot_dimension_numbers<[2], [1], [1], [2], [0, 0, 0, 1, 1, 2], [0], [0]>} : vector<4x8x32xbf16>, vector<4x32x8xbf16>, vector<4x8x8xf32> -> vector<4x8x8xf32>
    "tpu.trace_stop"() : () -> ()
    %45 = arith.index_cast %c0_i32 : i32 to index
    %c0_24 = arith.constant 0 : index
    %c0_25 = arith.constant 0 : index
    %c0_26 = arith.constant 0 : index
    %46 = vector.load %arg9[%45, %c0_24, %c0_25, %c0_26] : memref<2x4x1x8xf32, #tpu.memory_space<vmem>>, vector<1x4x1x8xf32>
    %47 = vector.shape_cast %46 : vector<1x4x1x8xf32> to vector<4x1x8xf32>
    %48 = vector.broadcast %47 : vector<4x1x8xf32> to vector<4x8x8xf32>
    %49 = arith.addf %44, %48 : vector<4x8x8xf32>
    %50 = arith.index_cast %c0_i32 : i32 to index
    %c0_27 = arith.constant 0 : index
    %c0_28 = arith.constant 0 : index
    %c0_29 = arith.constant 0 : index
    %51 = vector.load %arg7[%50, %c0_27, %c0_28, %c0_29] : memref<2x4x32x8xbf16, #tpu.memory_space<vmem>>, vector<1x4x32x8xbf16>
    %52 = vector.shape_cast %51 : vector<1x4x32x8xbf16> to vector<4x32x8xbf16>
    "tpu.trace_start"() <{level = 10 : i32, message = "hsd,hde->hse"}> : () -> ()
    %cst_30 = arith.constant dense<0.000000e+00> : vector<4x8x8xf32>
    %53 = tpu.matmul %31, %52, %cst_30 {dimension_numbers = #tpu.dot_dimension_numbers<[2], [1], [1], [2], [0, 0, 0, 1, 1, 2], [0], [0]>} : vector<4x8x32xbf16>, vector<4x32x8xbf16>, vector<4x8x8xf32> -> vector<4x8x8xf32>
    "tpu.trace_stop"() : () -> ()
    %54 = arith.index_cast %c0_i32 : i32 to index
    %c0_31 = arith.constant 0 : index
    %c0_32 = arith.constant 0 : index
    %c0_33 = arith.constant 0 : index
    %55 = vector.load %arg10[%54, %c0_31, %c0_32, %c0_33] : memref<2x4x1x8xf32, #tpu.memory_space<vmem>>, vector<1x4x1x8xf32>
    %56 = vector.shape_cast %55 : vector<1x4x1x8xf32> to vector<4x1x8xf32>
    %57 = vector.broadcast %56 : vector<4x1x8xf32> to vector<4x8x8xf32>
    %58 = arith.addf %53, %57 : vector<4x8x8xf32>
    %59 = arith.truncf %40 : vector<4x8x8xf32> to vector<4x8x8xbf16>
    %60 = arith.truncf %49 : vector<4x8x8xf32> to vector<4x8x8xbf16>
    "tpu.trace_start"() <{level = 10 : i32, message = "hqd,hkd->hqk"}> : () -> ()
    %cst_34 = arith.constant dense<0.000000e+00> : vector<4x8x8xf32>
    %61 = tpu.matmul %59, %60, %cst_34 {dimension_numbers = #tpu.dot_dimension_numbers<[2], [2], [1], [1], [0, 0, 0, 1, 1, 1], [0], [0]>} : vector<4x8x8xbf16>, vector<4x8x8xbf16>, vector<4x8x8xf32> -> vector<4x8x8xf32>
    "tpu.trace_stop"() : () -> ()
    %62 = vector.shape_cast %1 : vector<1x8xf32> to vector<1x1x8xf32>
    %63 = vector.broadcast %62 : vector<1x1x8xf32> to vector<4x8x8xf32>
    %64 = arith.addf %61, %63 : vector<4x8x8xf32>
    %cst_35 = arith.constant dense<0xFF800000> : vector<4x8xf32>
    %65 = vector.multi_reduction <maximumf>, %64, %cst_35 [2] : vector<4x8x8xf32> to vector<4x8xf32>
    %66 = vector.shape_cast %65 : vector<4x8xf32> to vector<4x8x1xf32>
    %67 = vector.broadcast %66 : vector<4x8x1xf32> to vector<4x8x8xf32>
    %68 = arith.subf %64, %67 : vector<4x8x8xf32>
    %69 = math.exp %68 : vector<4x8x8xf32>
    %cst_36 = arith.constant dense<0.000000e+00> : vector<4x8xf32>
    %70 = vector.multi_reduction <add>, %69, %cst_36 [2] : vector<4x8x8xf32> to vector<4x8xf32>
    %71 = vector.shape_cast %70 : vector<4x8xf32> to vector<4x8x1xf32>
    %72 = tpu.reciprocal %71 {approx = true} : vector<4x8x1xf32> -> vector<4x8x1xf32>
    %73 = vector.broadcast %72 : vector<4x8x1xf32> to vector<4x8x8xf32>
    %74 = arith.mulf %69, %73 : vector<4x8x8xf32>
    %75 = arith.truncf %74 : vector<4x8x8xf32> to vector<4x8x8xbf16>
    %76 = arith.truncf %58 : vector<4x8x8xf32> to vector<4x8x8xbf16>
    "tpu.trace_start"() <{level = 10 : i32, message = "hqk,hkd->hqd"}> : () -> ()
    %cst_37 = arith.constant dense<0.000000e+00> : vector<4x8x8xf32>
    %77 = tpu.matmul %75, %76, %cst_37 {dimension_numbers = #tpu.dot_dimension_numbers<[2], [1], [1], [2], [0, 0, 0, 1, 1, 2], [0], [0]>} : vector<4x8x8xbf16>, vector<4x8x8xbf16>, vector<4x8x8xf32> -> vector<4x8x8xf32>
    "tpu.trace_stop"() : () -> ()
    %78 = arith.truncf %77 : vector<4x8x8xf32> to vector<4x8x8xbf16>
    %79 = arith.index_cast %c0_i32 : i32 to index
    %c0_38 = arith.constant 0 : index
    %c0_39 = arith.constant 0 : index
    %c0_40 = arith.constant 0 : index
    %80 = vector.load %arg11[%79, %c0_38, %c0_39, %c0_40] : memref<2x4x8x32xbf16, #tpu.memory_space<vmem>>, vector<1x4x8x32xbf16>
    %81 = vector.shape_cast %80 : vector<1x4x8x32xbf16> to vector<4x8x32xbf16>
    "tpu.trace_start"() <{level = 10 : i32, message = "hsd,hdo->hso"}> : () -> ()
    %cst_41 = arith.constant dense<0.000000e+00> : vector<4x8x32xf32>
    %82 = tpu.matmul %78, %81, %cst_41 {dimension_numbers = #tpu.dot_dimension_numbers<[2], [1], [1], [2], [0, 0, 0, 1, 1, 2], [0], [0]>} : vector<4x8x8xbf16>, vector<4x8x32xbf16>, vector<4x8x32xf32> -> vector<4x8x32xf32>
    "tpu.trace_stop"() : () -> ()
    %cst_42 = arith.constant dense<0.000000e+00> : vector<8x32xf32>
    %83 = vector.multi_reduction <add>, %82, %cst_42 [0] : vector<4x8x32xf32> to vector<8x32xf32>
    %84 = arith.index_cast %c0_i32 : i32 to index
    %c0_43 = arith.constant 0 : index
    %c0_44 = arith.constant 0 : index
    %85 = vector.load %arg12[%84, %c0_43, %c0_44] : memref<2x1x32xf32, #tpu.memory_space<vmem>>, vector<1x1x32xf32>
    %86 = vector.shape_cast %85 : vector<1x1x32xf32> to vector<1x32xf32>
    %87 = vector.broadcast %86 : vector<1x32xf32> to vector<8x32xf32>
    %88 = arith.addf %83, %87 : vector<8x32xf32>
    %89 = arith.addf %27, %88 : vector<8x32xf32>
    %90 = arith.index_cast %c0_i32 : i32 to index
    %c0_45 = arith.constant 0 : index
    %c0_46 = arith.constant 0 : index
    %91 = vector.load %arg13[%90, %c0_45, %c0_46] : memref<2x1x32xf32, #tpu.memory_space<vmem>>, vector<1x1x32xf32>
    %92 = vector.shape_cast %91 : vector<1x1x32xf32> to vector<1x32xf32>
    %93 = arith.index_cast %c0_i32 : i32 to index
    %c0_47 = arith.constant 0 : index
    %c0_48 = arith.constant 0 : index
    %94 = vector.load %arg14[%93, %c0_47, %c0_48] : memref<2x1x32xf32, #tpu.memory_space<vmem>>, vector<1x1x32xf32>
    %95 = vector.shape_cast %94 : vector<1x1x32xf32> to vector<1x32xf32>
    %cst_49 = arith.constant dense<0.000000e+00> : vector<8xf32>
    %96 = vector.multi_reduction <add>, %89, %cst_49 [1] : vector<8x32xf32> to vector<8xf32>
    %97 = vector.shape_cast %96 : vector<8xf32> to vector<8x1xf32>
    %cst_50 = arith.constant 3.200000e+01 : f32
    %98 = vector.broadcast %cst_50 : f32 to vector<8x1xf32>
    %99 = arith.divf %97, %98 : vector<8x1xf32>
    %100 = vector.broadcast %99 : vector<8x1xf32> to vector<8x32xf32>
    %101 = arith.subf %89, %100 : vector<8x32xf32>
    %102 = arith.mulf %101, %101 : vector<8x32xf32>
    %cst_51 = arith.constant dense<0.000000e+00> : vector<8xf32>
    %103 = vector.multi_reduction <add>, %102, %cst_51 [1] : vector<8x32xf32> to vector<8xf32>
    %104 = vector.shape_cast %103 : vector<8xf32> to vector<8x1xf32>
    %cst_52 = arith.constant 3.200000e+01 : f32
    %105 = vector.broadcast %cst_52 : f32 to vector<8x1xf32>
    %106 = arith.divf %104, %105 : vector<8x1xf32>
    %107 = vector.broadcast %99 : vector<8x1xf32> to vector<8x32xf32>
    %108 = arith.subf %89, %107 : vector<8x32xf32>
    %cst_53 = arith.constant 9.99999996E-13 : f32
    %109 = vector.broadcast %cst_53 : f32 to vector<8x1xf32>
    %110 = arith.addf %106, %109 : vector<8x1xf32>
    %111 = math.rsqrt %110 : vector<8x1xf32>
    %112 = vector.broadcast %111 : vector<8x1xf32> to vector<8x32xf32>
    %113 = arith.mulf %108, %112 : vector<8x32xf32>
    %114 = vector.broadcast %92 : vector<1x32xf32> to vector<8x32xf32>
    %115 = arith.mulf %113, %114 : vector<8x32xf32>
    %116 = vector.broadcast %95 : vector<1x32xf32> to vector<8x32xf32>
    %117 = arith.addf %115, %116 : vector<8x32xf32>
    %118 = arith.truncf %117 : vector<8x32xf32> to vector<8x32xbf16>
    %119 = arith.index_cast %c0_i32 : i32 to index
    %c0_54 = arith.constant 0 : index
    %c0_55 = arith.constant 0 : index
    %120 = vector.load %arg15[%119, %c0_54, %c0_55] : memref<2x32x64xbf16, #tpu.memory_space<vmem>>, vector<1x32x64xbf16>
    %121 = vector.shape_cast %120 : vector<1x32x64xbf16> to vector<32x64xbf16>
    %cst_56 = arith.constant dense<0.000000e+00> : vector<8x64xf32>
    %122 = tpu.matmul %118, %121, %cst_56 {dimension_numbers = #tpu.dot_dimension_numbers<[1], [0], [0], [1], [0, 0, 1, 1], [], []>} : vector<8x32xbf16>, vector<32x64xbf16>, vector<8x64xf32> -> vector<8x64xf32>
    %123 = arith.index_cast %c0_i32 : i32 to index
    %c0_57 = arith.constant 0 : index
    %c0_58 = arith.constant 0 : index
    %124 = vector.load %arg16[%123, %c0_57, %c0_58] : memref<2x1x64xf32, #tpu.memory_space<vmem>>, vector<1x1x64xf32>
    %125 = vector.shape_cast %124 : vector<1x1x64xf32> to vector<1x64xf32>
    %126 = vector.broadcast %125 : vector<1x64xf32> to vector<8x64xf32>
    %127 = arith.addf %122, %126 : vector<8x64xf32>
    %cst_59 = arith.constant 5.000000e-01 : f32
    %128 = vector.broadcast %cst_59 : f32 to vector<8x64xf32>
    %129 = arith.mulf %128, %127 : vector<8x64xf32>
    %cst_60 = arith.constant 4.471500e-02 : f32
    %130 = vector.broadcast %cst_60 : f32 to vector<8x64xf32>
    %131 = arith.mulf %130, %127 : vector<8x64xf32>
    %132 = arith.mulf %131, %127 : vector<8x64xf32>
    %133 = arith.mulf %132, %127 : vector<8x64xf32>
    %134 = arith.addf %127, %133 : vector<8x64xf32>
    %cst_61 = arith.constant 0.797884583 : f32
    %135 = vector.broadcast %cst_61 : f32 to vector<8x64xf32>
    %136 = arith.mulf %135, %134 : vector<8x64xf32>
    %137 = math.tanh %136 : vector<8x64xf32>
    %cst_62 = arith.constant 1.000000e+00 : f32
    %138 = vector.broadcast %cst_62 : f32 to vector<8x64xf32>
    %139 = arith.addf %138, %137 : vector<8x64xf32>
    %140 = arith.mulf %129, %139 : vector<8x64xf32>
    %141 = arith.truncf %140 : vector<8x64xf32> to vector<8x64xbf16>
    %142 = arith.index_cast %c0_i32 : i32 to index
    %c0_63 = arith.constant 0 : index
    %c0_64 = arith.constant 0 : index
    %143 = vector.load %arg17[%142, %c0_63, %c0_64] : memref<2x64x32xbf16, #tpu.memory_space<vmem>>, vector<1x64x32xbf16>
    %144 = vector.shape_cast %143 : vector<1x64x32xbf16> to vector<64x32xbf16>
    %cst_65 = arith.constant dense<0.000000e+00> : vector<8x32xf32>
    %145 = tpu.matmul %141, %144, %cst_65 {dimension_numbers = #tpu.dot_dimension_numbers<[1], [0], [0], [1], [0, 0, 1, 1], [], []>} : vector<8x64xbf16>, vector<64x32xbf16>, vector<8x32xf32> -> vector<8x32xf32>
    %146 = arith.index_cast %c0_i32 : i32 to index
    %c0_66 = arith.constant 0 : index
    %c0_67 = arith.constant 0 : index
    %147 = vector.load %arg18[%146, %c0_66, %c0_67] : memref<2x1x32xf32, #tpu.memory_space<vmem>>, vector<1x1x32xf32>
    %148 = vector.shape_cast %147 : vector<1x1x32xf32> to vector<1x32xf32>
    %149 = vector.broadcast %148 : vector<1x32xf32> to vector<8x32xf32>
    %150 = arith.addf %145, %149 : vector<8x32xf32>
    %151 = arith.addf %117, %150 : vector<8x32xf32>
    %152 = arith.index_cast %c0_i32 : i32 to index
    %c0_68 = arith.constant 0 : index
    %c0_69 = arith.constant 0 : index
    %153 = vector.load %arg19[%152, %c0_68, %c0_69] : memref<2x1x32xf32, #tpu.memory_space<vmem>>, vector<1x1x32xf32>
    %154 = vector.shape_cast %153 : vector<1x1x32xf32> to vector<1x32xf32>
    %155 = arith.index_cast %c0_i32 : i32 to index
    %c0_70 = arith.constant 0 : index
    %c0_71 = arith.constant 0 : index
    %156 = vector.load %arg20[%155, %c0_70, %c0_71] : memref<2x1x32xf32, #tpu.memory_space<vmem>>, vector<1x1x32xf32>
    %157 = vector.shape_cast %156 : vector<1x1x32xf32> to vector<1x32xf32>
    %cst_72 = arith.constant dense<0.000000e+00> : vector<8xf32>
    %158 = vector.multi_reduction <add>, %151, %cst_72 [1] : vector<8x32xf32> to vector<8xf32>
    %159 = vector.shape_cast %158 : vector<8xf32> to vector<8x1xf32>
    %cst_73 = arith.constant 3.200000e+01 : f32
    %160 = vector.broadcast %cst_73 : f32 to vector<8x1xf32>
    %161 = arith.divf %159, %160 : vector<8x1xf32>
    %162 = vector.broadcast %161 : vector<8x1xf32> to vector<8x32xf32>
    %163 = arith.subf %151, %162 : vector<8x32xf32>
    %164 = arith.mulf %163, %163 : vector<8x32xf32>
    %cst_74 = arith.constant dense<0.000000e+00> : vector<8xf32>
    %165 = vector.multi_reduction <add>, %164, %cst_74 [1] : vector<8x32xf32> to vector<8xf32>
    %166 = vector.shape_cast %165 : vector<8xf32> to vector<8x1xf32>
    %cst_75 = arith.constant 3.200000e+01 : f32
    %167 = vector.broadcast %cst_75 : f32 to vector<8x1xf32>
    %168 = arith.divf %166, %167 : vector<8x1xf32>
    %169 = vector.broadcast %161 : vector<8x1xf32> to vector<8x32xf32>
    %170 = arith.subf %151, %169 : vector<8x32xf32>
    %cst_76 = arith.constant 9.99999996E-13 : f32
    %171 = vector.broadcast %cst_76 : f32 to vector<8x1xf32>
    %172 = arith.addf %168, %171 : vector<8x1xf32>
    %173 = math.rsqrt %172 : vector<8x1xf32>
    %174 = vector.broadcast %173 : vector<8x1xf32> to vector<8x32xf32>
    %175 = arith.mulf %170, %174 : vector<8x32xf32>
    %176 = vector.broadcast %154 : vector<1x32xf32> to vector<8x32xf32>
    %177 = arith.mulf %175, %176 : vector<8x32xf32>
    %178 = vector.broadcast %157 : vector<1x32xf32> to vector<8x32xf32>
    %179 = arith.addf %177, %178 : vector<8x32xf32>
    %c1_i32 = arith.constant 1 : i32
    %180 = arith.truncf %179 : vector<8x32xf32> to vector<8x32xbf16>
    %181 = vector.shape_cast %180 : vector<8x32xbf16> to vector<1x8x32xbf16>
    %182 = vector.shape_cast %181 : vector<1x8x32xbf16> to vector<1x8x32xbf16>
    %183 = vector.broadcast %182 : vector<1x8x32xbf16> to vector<4x8x32xbf16>
    %184 = arith.index_cast %c1_i32 : i32 to index
    %c0_77 = arith.constant 0 : index
    %c0_78 = arith.constant 0 : index
    %c0_79 = arith.constant 0 : index
    %185 = vector.load %arg5[%184, %c0_77, %c0_78, %c0_79] : memref<2x4x32x8xbf16, #tpu.memory_space<vmem>>, vector<1x4x32x8xbf16>
    %186 = vector.shape_cast %185 : vector<1x4x32x8xbf16> to vector<4x32x8xbf16>
    "tpu.trace_start"() <{level = 10 : i32, message = "hsd,hde->hse"}> : () -> ()
    %cst_80 = arith.constant dense<0.000000e+00> : vector<4x8x8xf32>
    %187 = tpu.matmul %183, %186, %cst_80 {dimension_numbers = #tpu.dot_dimension_numbers<[2], [1], [1], [2], [0, 0, 0, 1, 1, 2], [0], [0]>} : vector<4x8x32xbf16>, vector<4x32x8xbf16>, vector<4x8x8xf32> -> vector<4x8x8xf32>
    "tpu.trace_stop"() : () -> ()
    %188 = arith.index_cast %c1_i32 : i32 to index
    %c0_81 = arith.constant 0 : index
    %c0_82 = arith.constant 0 : index
    %c0_83 = arith.constant 0 : index
    %189 = vector.load %arg8[%188, %c0_81, %c0_82, %c0_83] : memref<2x4x1x8xf32, #tpu.memory_space<vmem>>, vector<1x4x1x8xf32>
    %190 = vector.shape_cast %189 : vector<1x4x1x8xf32> to vector<4x1x8xf32>
    %191 = vector.broadcast %190 : vector<4x1x8xf32> to vector<4x8x8xf32>
    %192 = arith.addf %187, %191 : vector<4x8x8xf32>
    %193 = arith.index_cast %c1_i32 : i32 to index
    %c0_84 = arith.constant 0 : index
    %c0_85 = arith.constant 0 : index
    %c0_86 = arith.constant 0 : index
    %194 = vector.load %arg6[%193, %c0_84, %c0_85, %c0_86] : memref<2x4x32x8xbf16, #tpu.memory_space<vmem>>, vector<1x4x32x8xbf16>
    %195 = vector.shape_cast %194 : vector<1x4x32x8xbf16> to vector<4x32x8xbf16>
    "tpu.trace_start"() <{level = 10 : i32, message = "hsd,hde->hse"}> : () -> ()
    %cst_87 = arith.constant dense<0.000000e+00> : vector<4x8x8xf32>
    %196 = tpu.matmul %183, %195, %cst_87 {dimension_numbers = #tpu.dot_dimension_numbers<[2], [1], [1], [2], [0, 0, 0, 1, 1, 2], [0], [0]>} : vector<4x8x32xbf16>, vector<4x32x8xbf16>, vector<4x8x8xf32> -> vector<4x8x8xf32>
    "tpu.trace_stop"() : () -> ()
    %197 = arith.index_cast %c1_i32 : i32 to index
    %c0_88 = arith.constant 0 : index
    %c0_89 = arith.constant 0 : index
    %c0_90 = arith.constant 0 : index
    %198 = vector.load %arg9[%197, %c0_88, %c0_89, %c0_90] : memref<2x4x1x8xf32, #tpu.memory_space<vmem>>, vector<1x4x1x8xf32>
    %199 = vector.shape_cast %198 : vector<1x4x1x8xf32> to vector<4x1x8xf32>
    %200 = vector.broadcast %199 : vector<4x1x8xf32> to vector<4x8x8xf32>
    %201 = arith.addf %196, %200 : vector<4x8x8xf32>
    %202 = arith.index_cast %c1_i32 : i32 to index
    %c0_91 = arith.constant 0 : index
    %c0_92 = arith.constant 0 : index
    %c0_93 = arith.constant 0 : index
    %203 = vector.load %arg7[%202, %c0_91, %c0_92, %c0_93] : memref<2x4x32x8xbf16, #tpu.memory_space<vmem>>, vector<1x4x32x8xbf16>
    %204 = vector.shape_cast %203 : vector<1x4x32x8xbf16> to vector<4x32x8xbf16>
    "tpu.trace_start"() <{level = 10 : i32, message = "hsd,hde->hse"}> : () -> ()
    %cst_94 = arith.constant dense<0.000000e+00> : vector<4x8x8xf32>
    %205 = tpu.matmul %183, %204, %cst_94 {dimension_numbers = #tpu.dot_dimension_numbers<[2], [1], [1], [2], [0, 0, 0, 1, 1, 2], [0], [0]>} : vector<4x8x32xbf16>, vector<4x32x8xbf16>, vector<4x8x8xf32> -> vector<4x8x8xf32>
    "tpu.trace_stop"() : () -> ()
    %206 = arith.index_cast %c1_i32 : i32 to index
    %c0_95 = arith.constant 0 : index
    %c0_96 = arith.constant 0 : index
    %c0_97 = arith.constant 0 : index
    %207 = vector.load %arg10[%206, %c0_95, %c0_96, %c0_97] : memref<2x4x1x8xf32, #tpu.memory_space<vmem>>, vector<1x4x1x8xf32>
    %208 = vector.shape_cast %207 : vector<1x4x1x8xf32> to vector<4x1x8xf32>
    %209 = vector.broadcast %208 : vector<4x1x8xf32> to vector<4x8x8xf32>
    %210 = arith.addf %205, %209 : vector<4x8x8xf32>
    %211 = arith.truncf %192 : vector<4x8x8xf32> to vector<4x8x8xbf16>
    %212 = arith.truncf %201 : vector<4x8x8xf32> to vector<4x8x8xbf16>
    "tpu.trace_start"() <{level = 10 : i32, message = "hqd,hkd->hqk"}> : () -> ()
    %cst_98 = arith.constant dense<0.000000e+00> : vector<4x8x8xf32>
    %213 = tpu.matmul %211, %212, %cst_98 {dimension_numbers = #tpu.dot_dimension_numbers<[2], [2], [1], [1], [0, 0, 0, 1, 1, 1], [0], [0]>} : vector<4x8x8xbf16>, vector<4x8x8xbf16>, vector<4x8x8xf32> -> vector<4x8x8xf32>
    "tpu.trace_stop"() : () -> ()
    %214 = vector.shape_cast %1 : vector<1x8xf32> to vector<1x1x8xf32>
    %215 = vector.broadcast %214 : vector<1x1x8xf32> to vector<4x8x8xf32>
    %216 = arith.addf %213, %215 : vector<4x8x8xf32>
    %cst_99 = arith.constant dense<0xFF800000> : vector<4x8xf32>
    %217 = vector.multi_reduction <maximumf>, %216, %cst_99 [2] : vector<4x8x8xf32> to vector<4x8xf32>
    %218 = vector.shape_cast %217 : vector<4x8xf32> to vector<4x8x1xf32>
    %219 = vector.broadcast %218 : vector<4x8x1xf32> to vector<4x8x8xf32>
    %220 = arith.subf %216, %219 : vector<4x8x8xf32>
    %221 = math.exp %220 : vector<4x8x8xf32>
    %cst_100 = arith.constant dense<0.000000e+00> : vector<4x8xf32>
    %222 = vector.multi_reduction <add>, %221, %cst_100 [2] : vector<4x8x8xf32> to vector<4x8xf32>
    %223 = vector.shape_cast %222 : vector<4x8xf32> to vector<4x8x1xf32>
    %224 = tpu.reciprocal %223 {approx = true} : vector<4x8x1xf32> -> vector<4x8x1xf32>
    %225 = vector.broadcast %224 : vector<4x8x1xf32> to vector<4x8x8xf32>
    %226 = arith.mulf %221, %225 : vector<4x8x8xf32>
    %227 = arith.truncf %226 : vector<4x8x8xf32> to vector<4x8x8xbf16>
    %228 = arith.truncf %210 : vector<4x8x8xf32> to vector<4x8x8xbf16>
    "tpu.trace_start"() <{level = 10 : i32, message = "hqk,hkd->hqd"}> : () -> ()
    %cst_101 = arith.constant dense<0.000000e+00> : vector<4x8x8xf32>
    %229 = tpu.matmul %227, %228, %cst_101 {dimension_numbers = #tpu.dot_dimension_numbers<[2], [1], [1], [2], [0, 0, 0, 1, 1, 2], [0], [0]>} : vector<4x8x8xbf16>, vector<4x8x8xbf16>, vector<4x8x8xf32> -> vector<4x8x8xf32>
    "tpu.trace_stop"() : () -> ()
    %230 = arith.truncf %229 : vector<4x8x8xf32> to vector<4x8x8xbf16>
    %231 = arith.index_cast %c1_i32 : i32 to index
    %c0_102 = arith.constant 0 : index
    %c0_103 = arith.constant 0 : index
    %c0_104 = arith.constant 0 : index
    %232 = vector.load %arg11[%231, %c0_102, %c0_103, %c0_104] : memref<2x4x8x32xbf16, #tpu.memory_space<vmem>>, vector<1x4x8x32xbf16>
    %233 = vector.shape_cast %232 : vector<1x4x8x32xbf16> to vector<4x8x32xbf16>
    "tpu.trace_start"() <{level = 10 : i32, message = "hsd,hdo->hso"}> : () -> ()
    %cst_105 = arith.constant dense<0.000000e+00> : vector<4x8x32xf32>
    %234 = tpu.matmul %230, %233, %cst_105 {dimension_numbers = #tpu.dot_dimension_numbers<[2], [1], [1], [2], [0, 0, 0, 1, 1, 2], [0], [0]>} : vector<4x8x8xbf16>, vector<4x8x32xbf16>, vector<4x8x32xf32> -> vector<4x8x32xf32>
    "tpu.trace_stop"() : () -> ()
    %cst_106 = arith.constant dense<0.000000e+00> : vector<8x32xf32>
    %235 = vector.multi_reduction <add>, %234, %cst_106 [0] : vector<4x8x32xf32> to vector<8x32xf32>
    %236 = arith.index_cast %c1_i32 : i32 to index
    %c0_107 = arith.constant 0 : index
    %c0_108 = arith.constant 0 : index
    %237 = vector.load %arg12[%236, %c0_107, %c0_108] : memref<2x1x32xf32, #tpu.memory_space<vmem>>, vector<1x1x32xf32>
    %238 = vector.shape_cast %237 : vector<1x1x32xf32> to vector<1x32xf32>
    %239 = vector.broadcast %238 : vector<1x32xf32> to vector<8x32xf32>
    %240 = arith.addf %235, %239 : vector<8x32xf32>
    %241 = arith.addf %179, %240 : vector<8x32xf32>
    %242 = arith.index_cast %c1_i32 : i32 to index
    %c0_109 = arith.constant 0 : index
    %c0_110 = arith.constant 0 : index
    %243 = vector.load %arg13[%242, %c0_109, %c0_110] : memref<2x1x32xf32, #tpu.memory_space<vmem>>, vector<1x1x32xf32>
    %244 = vector.shape_cast %243 : vector<1x1x32xf32> to vector<1x32xf32>
    %245 = arith.index_cast %c1_i32 : i32 to index
    %c0_111 = arith.constant 0 : index
    %c0_112 = arith.constant 0 : index
    %246 = vector.load %arg14[%245, %c0_111, %c0_112] : memref<2x1x32xf32, #tpu.memory_space<vmem>>, vector<1x1x32xf32>
    %247 = vector.shape_cast %246 : vector<1x1x32xf32> to vector<1x32xf32>
    %cst_113 = arith.constant dense<0.000000e+00> : vector<8xf32>
    %248 = vector.multi_reduction <add>, %241, %cst_113 [1] : vector<8x32xf32> to vector<8xf32>
    %249 = vector.shape_cast %248 : vector<8xf32> to vector<8x1xf32>
    %cst_114 = arith.constant 3.200000e+01 : f32
    %250 = vector.broadcast %cst_114 : f32 to vector<8x1xf32>
    %251 = arith.divf %249, %250 : vector<8x1xf32>
    %252 = vector.broadcast %251 : vector<8x1xf32> to vector<8x32xf32>
    %253 = arith.subf %241, %252 : vector<8x32xf32>
    %254 = arith.mulf %253, %253 : vector<8x32xf32>
    %cst_115 = arith.constant dense<0.000000e+00> : vector<8xf32>
    %255 = vector.multi_reduction <add>, %254, %cst_115 [1] : vector<8x32xf32> to vector<8xf32>
    %256 = vector.shape_cast %255 : vector<8xf32> to vector<8x1xf32>
    %cst_116 = arith.constant 3.200000e+01 : f32
    %257 = vector.broadcast %cst_116 : f32 to vector<8x1xf32>
    %258 = arith.divf %256, %257 : vector<8x1xf32>
    %259 = vector.broadcast %251 : vector<8x1xf32> to vector<8x32xf32>
    %260 = arith.subf %241, %259 : vector<8x32xf32>
    %cst_117 = arith.constant 9.99999996E-13 : f32
    %261 = vector.broadcast %cst_117 : f32 to vector<8x1xf32>
    %262 = arith.addf %258, %261 : vector<8x1xf32>
    %263 = math.rsqrt %262 : vector<8x1xf32>
    %264 = vector.broadcast %263 : vector<8x1xf32> to vector<8x32xf32>
    %265 = arith.mulf %260, %264 : vector<8x32xf32>
    %266 = vector.broadcast %244 : vector<1x32xf32> to vector<8x32xf32>
    %267 = arith.mulf %265, %266 : vector<8x32xf32>
    %268 = vector.broadcast %247 : vector<1x32xf32> to vector<8x32xf32>
    %269 = arith.addf %267, %268 : vector<8x32xf32>
    %270 = arith.truncf %269 : vector<8x32xf32> to vector<8x32xbf16>
    %271 = arith.index_cast %c1_i32 : i32 to index
    %c0_118 = arith.constant 0 : index
    %c0_119 = arith.constant 0 : index
    %272 = vector.load %arg15[%271, %c0_118, %c0_119] : memref<2x32x64xbf16, #tpu.memory_space<vmem>>, vector<1x32x64xbf16>
    %273 = vector.shape_cast %272 : vector<1x32x64xbf16> to vector<32x64xbf16>
    %cst_120 = arith.constant dense<0.000000e+00> : vector<8x64xf32>
    %274 = tpu.matmul %270, %273, %cst_120 {dimension_numbers = #tpu.dot_dimension_numbers<[1], [0], [0], [1], [0, 0, 1, 1], [], []>} : vector<8x32xbf16>, vector<32x64xbf16>, vector<8x64xf32> -> vector<8x64xf32>
    %275 = arith.index_cast %c1_i32 : i32 to index
    %c0_121 = arith.constant 0 : index
    %c0_122 = arith.constant 0 : index
    %276 = vector.load %arg16[%275, %c0_121, %c0_122] : memref<2x1x64xf32, #tpu.memory_space<vmem>>, vector<1x1x64xf32>
    %277 = vector.shape_cast %276 : vector<1x1x64xf32> to vector<1x64xf32>
    %278 = vector.broadcast %277 : vector<1x64xf32> to vector<8x64xf32>
    %279 = arith.addf %274, %278 : vector<8x64xf32>
    %cst_123 = arith.constant 5.000000e-01 : f32
    %280 = vector.broadcast %cst_123 : f32 to vector<8x64xf32>
    %281 = arith.mulf %280, %279 : vector<8x64xf32>
    %cst_124 = arith.constant 4.471500e-02 : f32
    %282 = vector.broadcast %cst_124 : f32 to vector<8x64xf32>
    %283 = arith.mulf %282, %279 : vector<8x64xf32>
    %284 = arith.mulf %283, %279 : vector<8x64xf32>
    %285 = arith.mulf %284, %279 : vector<8x64xf32>
    %286 = arith.addf %279, %285 : vector<8x64xf32>
    %cst_125 = arith.constant 0.797884583 : f32
    %287 = vector.broadcast %cst_125 : f32 to vector<8x64xf32>
    %288 = arith.mulf %287, %286 : vector<8x64xf32>
    %289 = math.tanh %288 : vector<8x64xf32>
    %cst_126 = arith.constant 1.000000e+00 : f32
    %290 = vector.broadcast %cst_126 : f32 to vector<8x64xf32>
    %291 = arith.addf %290, %289 : vector<8x64xf32>
    %292 = arith.mulf %281, %291 : vector<8x64xf32>
    %293 = arith.truncf %292 : vector<8x64xf32> to vector<8x64xbf16>
    %294 = arith.index_cast %c1_i32 : i32 to index
    %c0_127 = arith.constant 0 : index
    %c0_128 = arith.constant 0 : index
    %295 = vector.load %arg17[%294, %c0_127, %c0_128] : memref<2x64x32xbf16, #tpu.memory_space<vmem>>, vector<1x64x32xbf16>
    %296 = vector.shape_cast %295 : vector<1x64x32xbf16> to vector<64x32xbf16>
    %cst_129 = arith.constant dense<0.000000e+00> : vector<8x32xf32>
    %297 = tpu.matmul %293, %296, %cst_129 {dimension_numbers = #tpu.dot_dimension_numbers<[1], [0], [0], [1], [0, 0, 1, 1], [], []>} : vector<8x64xbf16>, vector<64x32xbf16>, vector<8x32xf32> -> vector<8x32xf32>
    %298 = arith.index_cast %c1_i32 : i32 to index
    %c0_130 = arith.constant 0 : index
    %c0_131 = arith.constant 0 : index
    %299 = vector.load %arg18[%298, %c0_130, %c0_131] : memref<2x1x32xf32, #tpu.memory_space<vmem>>, vector<1x1x32xf32>
    %300 = vector.shape_cast %299 : vector<1x1x32xf32> to vector<1x32xf32>
    %301 = vector.broadcast %300 : vector<1x32xf32> to vector<8x32xf32>
    %302 = arith.addf %297, %301 : vector<8x32xf32>
    %303 = arith.addf %269, %302 : vector<8x32xf32>
    %304 = arith.index_cast %c1_i32 : i32 to index
    %c0_132 = arith.constant 0 : index
    %c0_133 = arith.constant 0 : index
    %305 = vector.load %arg19[%304, %c0_132, %c0_133] : memref<2x1x32xf32, #tpu.memory_space<vmem>>, vector<1x1x32xf32>
    %306 = vector.shape_cast %305 : vector<1x1x32xf32> to vector<1x32xf32>
    %307 = arith.index_cast %c1_i32 : i32 to index
    %c0_134 = arith.constant 0 : index
    %c0_135 = arith.constant 0 : index
    %308 = vector.load %arg20[%307, %c0_134, %c0_135] : memref<2x1x32xf32, #tpu.memory_space<vmem>>, vector<1x1x32xf32>
    %309 = vector.shape_cast %308 : vector<1x1x32xf32> to vector<1x32xf32>
    %cst_136 = arith.constant dense<0.000000e+00> : vector<8xf32>
    %310 = vector.multi_reduction <add>, %303, %cst_136 [1] : vector<8x32xf32> to vector<8xf32>
    %311 = vector.shape_cast %310 : vector<8xf32> to vector<8x1xf32>
    %cst_137 = arith.constant 3.200000e+01 : f32
    %312 = vector.broadcast %cst_137 : f32 to vector<8x1xf32>
    %313 = arith.divf %311, %312 : vector<8x1xf32>
    %314 = vector.broadcast %313 : vector<8x1xf32> to vector<8x32xf32>
    %315 = arith.subf %303, %314 : vector<8x32xf32>
    %316 = arith.mulf %315, %315 : vector<8x32xf32>
    %cst_138 = arith.constant dense<0.000000e+00> : vector<8xf32>
    %317 = vector.multi_reduction <add>, %316, %cst_138 [1] : vector<8x32xf32> to vector<8xf32>
    %318 = vector.shape_cast %317 : vector<8xf32> to vector<8x1xf32>
    %cst_139 = arith.constant 3.200000e+01 : f32
    %319 = vector.broadcast %cst_139 : f32 to vector<8x1xf32>
    %320 = arith.divf %318, %319 : vector<8x1xf32>
    %321 = vector.broadcast %313 : vector<8x1xf32> to vector<8x32xf32>
    %322 = arith.subf %303, %321 : vector<8x32xf32>
    %cst_140 = arith.constant 9.99999996E-13 : f32
    %323 = vector.broadcast %cst_140 : f32 to vector<8x1xf32>
    %324 = arith.addf %320, %323 : vector<8x1xf32>
    %325 = math.rsqrt %324 : vector<8x1xf32>
    %326 = vector.broadcast %325 : vector<8x1xf32> to vector<8x32xf32>
    %327 = arith.mulf %322, %326 : vector<8x32xf32>
    %328 = vector.broadcast %306 : vector<1x32xf32> to vector<8x32xf32>
    %329 = arith.mulf %327, %328 : vector<8x32xf32>
    %330 = vector.broadcast %309 : vector<1x32xf32> to vector<8x32xf32>
    %331 = arith.addf %329, %330 : vector<8x32xf32>
    %c2_i32 = arith.constant 2 : i32
    %332 = vector.extract_strided_slice %331 {offsets = [0, 0], sizes = [1, 32], strides = [1, 1]} : vector<8x32xf32> to vector<1x32xf32>
    %333 = arith.truncf %332 : vector<1x32xf32> to vector<1x32xbf16>
    %c0_141 = arith.constant 0 : index
    %c0_142 = arith.constant 0 : index
    %334 = vector.load %arg21[%c0_141, %c0_142] : memref<32x32xbf16, #tpu.memory_space<vmem>>, vector<32x32xbf16>
    %cst_143 = arith.constant dense<0.000000e+00> : vector<1x32xf32>
    %335 = tpu.matmul %333, %334, %cst_143 {dimension_numbers = #tpu.dot_dimension_numbers<[1], [0], [0], [1], [0, 0, 1, 1], [], []>} : vector<1x32xbf16>, vector<32x32xbf16>, vector<1x32xf32> -> vector<1x32xf32>
    %c0_144 = arith.constant 0 : index
    %c0_145 = arith.constant 0 : index
    %336 = vector.load %arg22[%c0_144, %c0_145] : memref<1x32xf32, #tpu.memory_space<vmem>>, vector<1x32xf32>
    %337 = arith.addf %335, %336 : vector<1x32xf32>
    %338 = math.tanh %337 : vector<1x32xf32>
    %339 = arith.truncf %338 : vector<1x32xf32> to vector<1x32xbf16>
    %c0_146 = arith.constant 0 : index
    %c0_147 = arith.constant 0 : index
    %340 = vector.load %arg23[%c0_146, %c0_147] : memref<32x128xbf16, #tpu.memory_space<vmem>>, vector<32x128xbf16>
    %cst_148 = arith.constant dense<0.000000e+00> : vector<1x128xf32>
    %341 = tpu.matmul %339, %340, %cst_148 {dimension_numbers = #tpu.dot_dimension_numbers<[1], [0], [0], [1], [0, 0, 1, 1], [], []>} : vector<1x32xbf16>, vector<32x128xbf16>, vector<1x128xf32> -> vector<1x128xf32>
    %c0_149 = arith.constant 0 : index
    %c0_150 = arith.constant 0 : index
    %342 = vector.load %arg24[%c0_149, %c0_150] : memref<1x128xf32, #tpu.memory_space<vmem>>, vector<1x128xf32>
    %343 = arith.addf %341, %342 : vector<1x128xf32>
    %c0_151 = arith.constant 0 : index
    %c0_152 = arith.constant 0 : index
    %c0_153 = arith.constant 0 : index
    %344 = vector.load %arg25[%c0_151, %c0_152, %c0_153] : memref<1x1x128xf32, #tpu.memory_space<vmem>>, vector<1x1x128xf32>
    %345 = vector.shape_cast %344 : vector<1x1x128xf32> to vector<1x128xf32>
    %346 = vector.shape_cast %343 : vector<1x128xf32> to vector<1x1x128xf32>
    tpu.vector_store %arg25[%c0_151, %c0_152, %c0_153], %346 {strides = array<i32>} : memref<1x1x128xf32, #tpu.memory_space<vmem>>, vector<1x1x128xf32>,
    return
  }
  func.func @transform_0(%arg0: i32) -> (i32, i32, i32) {
    %c0_i32 = arith.constant 0 : i32
    %c0_i32_0 = arith.constant 0 : i32
    %c0_i32_1 = arith.constant 0 : i32
    return %arg0, %c0_i32, %c0_i32_0 : i32, i32, i32
  }
  func.func @transform_1(%arg0: i32) -> (i32, i32, i32) {
    %c0_i32 = arith.constant 0 : i32
    %c0_i32_0 = arith.constant 0 : i32
    %c0_i32_1 = arith.constant 0 : i32
    return %arg0, %c0_i32, %c0_i32_0 : i32, i32, i32
  }
  func.func @transform_2(%arg0: i32) -> (i32, i32) {
    %c0_i32 = arith.constant 0 : i32
    %c0_i32_0 = arith.constant 0 : i32
    %c0_i32_1 = arith.constant 0 : i32
    return %c0_i32, %c0_i32_0 : i32, i32
  }
  func.func @transform_3(%arg0: i32) -> (i32, i32) {
    %c0_i32 = arith.constant 0 : i32
    %c0_i32_0 = arith.constant 0 : i32
    %c0_i32_1 = arith.constant 0 : i32
    return %c0_i32, %c0_i32_0 : i32, i32
  }
  func.func @transform_4(%arg0: i32) -> (i32, i32, i32, i32) {
    %c0_i32 = arith.constant 0 : i32
    %c0_i32_0 = arith.constant 0 : i32
    %c0_i32_1 = arith.constant 0 : i32
    %c0_i32_2 = arith.constant 0 : i32
    %c0_i32_3 = arith.constant 0 : i32
    return %c0_i32, %c0_i32_0, %c0_i32_1, %c0_i32_2 : i32, i32, i32, i32
  }
  func.func @transform_5(%arg0: i32) -> (i32, i32, i32, i32) {
    %c0_i32 = arith.constant 0 : i32
    %c0_i32_0 = arith.constant 0 : i32
    %c0_i32_1 = arith.constant 0 : i32
    %c0_i32_2 = arith.constant 0 : i32
    %c0_i32_3 = arith.constant 0 : i32
    return %c0_i32, %c0_i32_0, %c0_i32_1, %c0_i32_2 : i32, i32, i32, i32
  }
  func.func @transform_6(%arg0: i32) -> (i32, i32, i32, i32) {
    %c0_i32 = arith.constant 0 : i32
    %c0_i32_0 = arith.constant 0 : i32
    %c0_i32_1 = arith.constant 0 : i32
    %c0_i32_2 = arith.constant 0 : i32
    %c0_i32_3 = arith.constant 0 : i32
    return %c0_i32, %c0_i32_0, %c0_i32_1, %c0_i32_2 : i32, i32, i32, i32
  }
  func.func @transform_7(%arg0: i32) -> (i32, i32, i32, i32) {
    %c0_i32 = arith.constant 0 : i32
    %c0_i32_0 = arith.constant 0 : i32
    %c0_i32_1 = arith.constant 0 : i32
    %c0_i32_2 = arith.constant 0 : i32
    %c0_i32_3 = arith.constant 0 : i32
    return %c0_i32, %c0_i32_0, %c0_i32_1, %c0_i32_2 : i32, i32, i32, i32
  }
  func.func @transform_8(%arg0: i32) -> (i32, i32, i32, i32) {
    %c0_i32 = arith.constant 0 : i32
    %c0_i32_0 = arith.constant 0 : i32
    %c0_i32_1 = arith.constant 0 : i32
    %c0_i32_2 = arith.constant 0 : i32
    %c0_i32_3 = arith.constant 0 : i32
    return %c0_i32, %c0_i32_0, %c0_i32_1, %c0_i32_2 : i32, i32, i32, i32
  }
  func.func @transform_9(%arg0: i32) -> (i32, i32, i32, i32) {
    %c0_i32 = arith.constant 0 : i32
    %c0_i32_0 = arith.constant 0 : i32
    %c0_i32_1 = arith.constant 0 : i32
    %c0_i32_2 = arith.constant 0 : i32
    %c0_i32_3 = arith.constant 0 : i32
    return %c0_i32, %c0_i32_0, %c0_i32_1, %c0_i32_2 : i32, i32, i32, i32
  }
  func.func @transform_10(%arg0: i32) -> (i32, i32, i32, i32) {
    %c0_i32 = arith.constant 0 : i32
    %c0_i32_0 = arith.constant 0 : i32
    %c0_i32_1 = arith.constant 0 : i32
    %c0_i32_2 = arith.constant 0 : i32
    %c0_i32_3 = arith.constant 0 : i32
    return %c0_i32, %c0_i32_0, %c0_i32_1, %c0_i32_2 : i32, i32, i32, i32
  }
  func.func @transform_11(%arg0: i32) -> (i32, i32, i32) {
    %c0_i32 = arith.constant 0 : i32
    %c0_i32_0 = arith.constant 0 : i32
    %c0_i32_1 = arith.constant 0 : i32
    %c0_i32_2 = arith.constant 0 : i32
    return %c0_i32, %c0_i32_0, %c0_i32_1 : i32, i32, i32
  }
  func.func @transform_12(%arg0: i32) -> (i32, i32, i32) {
    %c0_i32 = arith.constant 0 : i32
    %c0_i32_0 = arith.constant 0 : i32
    %c0_i32_1 = arith.constant 0 : i32
    %c0_i32_2 = arith.constant 0 : i32
    return %c0_i32, %c0_i32_0, %c0_i32_1 : i32, i32, i32
  }
  func.func @transform_13(%arg0: i32) -> (i32, i32, i32) {
    %c0_i32 = arith.constant 0 : i32
    %c0_i32_0 = arith.constant 0 : i32
    %c0_i32_1 = arith.constant 0 : i32
    %c0_i32_2 = arith.constant 0 : i32
    return %c0_i32, %c0_i32_0, %c0_i32_1 : i32, i32, i32
  }
  func.func @transform_14(%arg0: i32) -> (i32, i32, i32) {
    %c0_i32 = arith.constant 0 : i32
    %c0_i32_0 = arith.constant 0 : i32
    %c0_i32_1 = arith.constant 0 : i32
    %c0_i32_2 = arith.constant 0 : i32
    return %c0_i32, %c0_i32_0, %c0_i32_1 : i32, i32, i32
  }
  func.func @transform_15(%arg0: i32) -> (i32, i32, i32) {
    %c0_i32 = arith.constant 0 : i32
    %c0_i32_0 = arith.constant 0 : i32
    %c0_i32_1 = arith.constant 0 : i32
    %c0_i32_2 = arith.constant 0 : i32
    return %c0_i32, %c0_i32_0, %c0_i32_1 : i32, i32, i32
  }
  func.func @transform_16(%arg0: i32) -> (i32, i32, i32) {
    %c0_i32 = arith.constant 0 : i32
    %c0_i32_0 = arith.constant 0 : i32
    %c0_i32_1 = arith.constant 0 : i32
    %c0_i32_2 = arith.constant 0 : i32
    return %c0_i32, %c0_i32_0, %c0_i32_1 : i32, i32, i32
  }
  func.func @transform_17(%arg0: i32) -> (i32, i32, i32) {
    %c0_i32 = arith.constant 0 : i32
    %c0_i32_0 = arith.constant 0 : i32
    %c0_i32_1 = arith.constant 0 : i32
    %c0_i32_2 = arith.constant 0 : i32
    return %c0_i32, %c0_i32_0, %c0_i32_1 : i32, i32, i32
  }
  func.func @transform_18(%arg0: i32) -> (i32, i32, i32) {
    %c0_i32 = arith.constant 0 : i32
    %c0_i32_0 = arith.constant 0 : i32
    %c0_i32_1 = arith.constant 0 : i32
    %c0_i32_2 = arith.constant 0 : i32
    return %c0_i32, %c0_i32_0, %c0_i32_1 : i32, i32, i32
  }
  func.func @transform_19(%arg0: i32) -> (i32, i32, i32) {
    %c0_i32 = arith.constant 0 : i32
    %c0_i32_0 = arith.constant 0 : i32
    %c0_i32_1 = arith.constant 0 : i32
    %c0_i32_2 = arith.constant 0 : i32
    return %c0_i32, %c0_i32_0, %c0_i32_1 : i32, i32, i32
  }
  func.func @transform_20(%arg0: i32) -> (i32, i32) {
    %c0_i32 = arith.constant 0 : i32
    %c0_i32_0 = arith.constant 0 : i32
    %c0_i32_1 = arith.constant 0 : i32
    return %c0_i32, %c0_i32_0 : i32, i32
  }
  func.func @transform_21(%arg0: i32) -> (i32, i32) {
    %c0_i32 = arith.constant 0 : i32
    %c0_i32_0 = arith.constant 0 : i32
    %c0_i32_1 = arith.constant 0 : i32
    return %c0_i32, %c0_i32_0 : i32, i32
  }
  func.func @transform_22(%arg0: i32) -> (i32, i32) {
    %c0_i32 = arith.constant 0 : i32
    %c0_i32_0 = arith.constant 0 : i32
    %c0_i32_1 = arith.constant 0 : i32
    return %c0_i32, %c0_i32_0 : i32, i32
  }
  func.func @transform_23(%arg0: i32) -> (i32, i32) {
    %c0_i32 = arith.constant 0 : i32
    %c0_i32_0 = arith.constant 0 : i32
    %c0_i32_1 = arith.constant 0 : i32
    return %c0_i32, %c0_i32_0 : i32, i32
  }
  func.func @transform_24(%arg0: i32) -> (i32, i32, i32) {
    %c0_i32 = arith.constant 0 : i32
    %c0_i32_0 = arith.constant 0 : i32
    %c0_i32_1 = arith.constant 0 : i32
    return %arg0, %c0_i32, %c0_i32_0 : i32, i32, i32
  }
}

</mosaic_0001>

<bundles_post_ra>
// kernel: tpu_custom_call.1
= control target key start
LH: loop header
LB: loop body
LE: loop exit
PB: predicated region body
PF: predicated region fallthrough
CT: control target
= control target key end

     0   :  { %s6180_s0 = inlined_call_operand.vmem [shape: f32[2,8,32], index: 0, kind: input, shape index: {}]   ;;  %s6181_s1 = inlined_call_operand.vmem [shape: f32[2,1,8], index: 1, kind: input, shape index: {}]   ;;  %s6182_s2 = inlined_call_operand.vmem [shape: f32[1,32], index: 2, kind: input, shape index: {}]   ;;  %s6183_s3 = inlined_call_operand.vmem [shape: f32[1,32], index: 3, kind: input, shape index: {}]   ;;  %s6184_s4 = inlined_call_operand.vmem [shape: bf16[2,4,32,8], index: 4, kind: input, shape index: {}]   ;;  %s6185_s5 = inlined_call_operand.vmem [shape: bf16[2,4,32,8], index: 5, kind: input, shape index: {}]   ;;  %s6186_s6 = inlined_call_operand.vmem [shape: bf16[2,4,32,8], index: 6, kind: input, shape index: {}]   ;;  %s6187_s7 = inlined_call_operand.vmem [shape: f32[2,4,1,8], index: 7, kind: input, shape index: {}]   ;;  %s6188_s8 = inlined_call_operand.vmem [shape: f32[2,4,1,8], index: 8, kind: input, shape index: {}]   ;;  %s6189_s9 = inlined_call_operand.vmem [shape: f32[2,4,1,8], index: 9, kind: input, shape index: {}]   ;;  %s6190_s10 = inlined_call_operand.vmem [shape: bf16[2,4,8,32], index: 10, kind: input, shape index: {}]   ;;  %s6191_s11 = inlined_call_operand.vmem [shape: f32[2,1,32], index: 11, kind: input, shape index: {}]   ;;  %s6192_s12 = inlined_call_operand.vmem [shape: f32[2,1,32], index: 12, kind: input, shape index: {}]   ;;  %s6193_s13 = inlined_call_operand.vmem [shape: f32[2,1,32], index: 13, kind: input, shape index: {}]   ;;  %s6194_s14 = inlined_call_operand.vmem [shape: bf16[2,32,64], index: 14, kind: input, shape index: {}]   ;;  %s6195_s15 = inlined_call_operand.vmem [shape: f32[2,1,64], index: 15, kind: input, shape index: {}]   ;;  %s6196_s16 = inlined_call_operand.vmem [shape: bf16[2,64,32], index: 16, kind: input, shape index: {}]   ;;  %s6197_s17 = inlined_call_operand.vmem [shape: f32[2,1,32], index: 17, kind: input, shape index: {}]   ;;  %s6198_s18 = inlined_call_operand.vmem [shape: f32[2,1,32], index: 18, kind: input, shape index: {}]   ;;  %s6199_s19 = inlined_call_operand.vmem [shape: f32[2,1,32], index: 19, kind: input, shape index: {}]   ;;  %s6200_s20 = inlined_call_operand.vmem [shape: bf16[32,32], index: 20, kind: input, shape index: {}]   ;;  %s6201_s21 = inlined_call_operand.vmem [shape: f32[1,32], index: 21, kind: input, shape index: {}]   ;;  %s6202_s22 = inlined_call_operand.vmem [shape: bf16[32,128], index: 22, kind: input, shape index: {}]   ;;  %s6203_s23 = inlined_call_operand.vmem [shape: f32[1,128], index: 23, kind: input, shape index: {}]   ;;  %s6204_s24 = inlined_call_operand.hbm [shape: f32[2,1,128], index: 24, kind: output, shape index: {}]  }
   0x1   :  { %6222 = sst [smem:[#allocation12_spill]] %s6180_s0 }
   0x2   :  { %6223 = sst [smem:[#allocation13_spill]] %s6181_s1 }
   0x3   :  { %6224 = sst [smem:[#allocation14_spill]] %s6182_s2 }
   0x4   :  { %6225 = sst [smem:[#allocation15_spill]] %s6183_s3 }
   0x5   :  { %6226 = sst [smem:[#allocation16_spill]] %s6184_s4 }
   0x6   :  { %6227 = sst [smem:[#allocation17_spill]] %s6185_s5 }
   0x7   :  { %6228 = sst [smem:[#allocation18_spill]] %s6186_s6 }
   0x8   :  { %6229 = sst [smem:[#allocation19_spill]] %s6187_s7 }
   0x9   :  { %6230 = sst [smem:[#allocation20_spill]] %s6188_s8 }
   0xa   :  { %6231 = sst [smem:[#allocation21_spill]] %s6204_s24 }
   0xb   :  { %29 = vsyncpa [#allocation3], 0 }
   0xc   :  { %31 = vsyncpa [#allocation3 + $0x1], 0  ;;  %s5363_s5 = smov 0   ;;  %s5365_s26 = smov 0  }
   0xd   :  { %s5367_s27 = smov 0   ;;  %s5369_s28 = smov 0  }
   0xe LB: > { %6232 = sst [smem:[#allocation5_spill]] %s5221_s5  ;;  %s5384_s6 = sadd.s32 4294967295, %s5233_s28   ;;  %s5233_s28 = sphi %s5369_s28, %s6256_s28   ;;  %s5229_s27 = sphi %s5367_s27, %s6258_s27   ;;  %s5225_s26 = sphi %s5365_s26, %s6260_s26   ;;  %s5221_s5 = sphi %s5363_s5, %s6259_s5  }
   0xf   : > { %6233 = sst [smem:[#allocation6_spill]] %s5229_s27  ;;  %s4234_s2 = sadd.s32 4294967294, %s5233_s28  }
  0x10   : > { %6234 = sst [smem:[#allocation7_spill]] %s5233_s28  ;;  %s5388_s29 = sadd.s32 1, %s5233_s28  }
  0x11   : > { %6235 = sst [smem:[#allocation8_spill]] %s5388_s29  ;;  %s558_s0 = sadd.s32 1, %s5229_s27 }
  0x12   : > { %s555_s7 = ssub.s32 %s5233_s28, %s5388_s29  ;;  %p568_p0 = scmp.ne.s32.totalorder %s5229_s27, %s5225_s26 }
  0x13   : > { %p556_p1 = scmp.eq.s32.totalorder %s555_s7, 0  ;;  %p569_p2 = scmp.eq.s32.totalorder %s5384_s6, 1 }
  0x14   : > { %p574_p3 = scmp.ne.s32.totalorder %s5225_s26, %s5221_s5  ;;  %p575_p4 = scmp.eq.s32.totalorder %s4234_s2, 1 }
  0x15   : > { %s5399_s30 = scalar_select %p556_p1, %s5229_s27, %s558_s0  }
  0x16   : > { %p5401_p5 = por %p569_p2, %p568_p0  ;;  %p5405_p6 = por %p575_p4, %p574_p3 }
  0x17   : > { %6236 = sst [smem:[#allocation9_spill]] %s5399_s30  ;;  %p4237_p7 = scmp.ge.s32.totalorder %s5233_s28, 1 }
  0x18   : > { %s6237_s3 = scalar_select %p5401_p5, 1, 0 }
  0x19   : > { %s6239_s25 = scalar_select %p5405_p6, 1, 0 }
  0x1a   : > { %6238 = sst [smem:[#allocation10_spill]] %s6237_s3  ;;  %p672_p8 = scmp.lt.s32.totalorder %s5233_s28, 3 }
  0x1b   : > { %6240 = sst [smem:[#allocation11_spill]] %s6239_s25 }
  0x1c   : > { %p673_p9 = pnand %p4237_p7, %p672_p8 }
  0x1d   : > { %p739_p10 = scmp.lt.s32.totalorder (!%p673_p9), %s5384_s6, 1  ;;  %vm751_vm0 = vcmask (!%p673_p9), 261120   ;;  %s6241_s0 = sld [smem:[#allocation12_spill]] (!%p673_p9)  ;;  %v5235_v9 = vmov (!%p673_p9), 0.0   ;;  %vm5236_vm1 = vmmov (!%p673_p9), 0   ;;  %vm1554_vm2 = vcmask (!%p673_p9), 64512  }
  0x1e   : > { %676 = sbr.rel (%p673_p9) target bundleno = 5420 (0x152c), region = 116  ;;  %s6242_s29 = sld [smem:[#allocation16_spill]] (!%p673_p9)  ;;  %4626 = vmatprep.subr.bf16.mxu0 (!%p673_p9), %v5235_v9  ;;  %4634 = vmatprep.subr.bf16.mxu1 (!%p673_p9), %v5235_v9  ;;  %vm1794_vm3 = vcmask (!%p673_p9), 1043456   ;;  %vm2329_vm4 = vcmask (!%p673_p9), 523264  }
  0x1f   : > { %4630 = vmatprep.mubr.msk.bf16.mxu0 (!%p673_p9), %vm5236_vm1, %v5235_v9  ;;  %4638 = vmatprep.mubr.msk.bf16.mxu1 (!%p673_p9), %vm5236_vm1, %v5235_v9  ;;  %s6243_s2 = sld [smem:[#allocation14_spill]] (!%p673_p9)  ;;  %s6246_s28 = sld [smem:[#allocation18_spill]] (!%p673_p9) }
  0x20   : > { %s6248_s1 = sld [smem:[#allocation20_spill]] (!%p673_p9)  ;;  %s6250_s5 = sld [smem:[#allocation13_spill]] (!%p673_p9) }
  0x21   : > { %s4481_s24 = sshll.u32 (!%p673_p9), %s5384_s6, 4  ;;  %s5237_s27 = smov (!%p673_p9), [#allocation2]  }
  0x24   : > { %v5059_v7 = vld [vmem:[%s6242_s29] sm:$0xff] (!%p673_p9)   ;;  %v5060_v8 = vld [vmem:[%s6242_s29 + $0x10] sm:$0xff] (!%p673_p9)   ;;  %v5061_v10 = vld [vmem:[%s6242_s29 + $0x8] sm:$0xff] (!%p673_p9)  }
  0x25   : > { %s5413_s8 = scalar_select %p739_p10, %s5384_s6, 1  ;;  %4627 = vmatpush3.bf16.msra.mxu0 %v5059_v7  ;;  %4635 = vmatpush3.bf16.msra.mxu1 %v5060_v8  ;;  %v5062_v11 = vld [vmem:[%s6242_s29 + $0x18] sm:$0xff]   ;;  %v4239_v16 = vld [vmem:[%s6243_s2] ss:$0 sm:$0xff]  ;;  %v5064_v22 = vld [vmem:[%s6242_s29 + $0x30] sm:$0xff]  }
  0x26   : > { %4628 = vmatprep.subr.bf16.mxu0 %v5235_v9  ;;  %4636 = vmatprep.subr.bf16.mxu1 %v5235_v9  ;;  %v5063_v21 = vld [vmem:[%s6242_s29 + $0x20] sm:$0xff]   ;;  %v5065_v24 = vld [vmem:[%s6242_s29 + $0x28] sm:$0xff]   ;;  %v5066_v25 = vld [vmem:[%s6242_s29 + $0x38] sm:$0xff]   ;;  %s6249_s2 = sld [smem:[#allocation19_spill]] }
  0x27   : > { %s4238_s4 = sshll.u32 %s5413_s8, 3  ;;  %v5075_v34 = vld [vmem:[%s6246_s28] sm:$0xff]   ;;  %s745_s25 = scalar_lea.vmem %s6250_s5, %s5413_s8 }
  0x28   : > { %s742_s7 = scalar_lea.vmem %s6241_s0, %s4238_s4  ;;  %s6244_s4 = sld [smem:[#allocation15_spill]]  ;;  %v4257_v58 = vld [vmem:[%s6248_s1] ss:$0 sm:$0xff]  ;;  %v4258_v59 = vld [vmem:[%s6248_s1 + $0x1] ss:$0 sm:$0xff] }
  0x29   : > { %v748_v0 = vld [vmem:[%s742_s7] sm:$0xff]  ;;  %4629 = vmatpush3.bf16.msra.mxu0 %v5061_v10  ;;  %4637 = vmatpush3.bf16.msra.mxu1 %v5062_v11  ;;  %s6247_s7 = smov %s6246_s28  ;;  %s737_s0 = sand.u32 1, %s5225_s26  }
  0x2a   : > { %v752_v1 = vsel %vm751_vm0, %v748_v0, 0.0  ;;  %4642 = vmatprep.subr.bf16.mxu0 %v5235_v9  ;;  %4650 = vmatprep.subr.bf16.mxu1 %v5235_v9  ;;  %v5076_v35 = vld [vmem:[%s6247_s7 + $0x10] sm:$0xff]   ;;  %v5077_v36 = vld [vmem:[%s6247_s7 + $0x8] sm:$0xff]   ;;  %v5078_v37 = vld [vmem:[%s6247_s7 + $0x18] sm:$0xff]   ;;  %s738_s3 = scalar_lea.vmem [#allocation2], %s737_s0  ;;  %s4158_s28 = scalar_lea.sflag [#allocation3], %s737_s0 }
  0x2b   : > { %753 = vadd.xlane.f32.xlu0 %v752_v1  ;;  %v5079_v38 = vld [vmem:[%s6247_s7 + $0x20] sm:$0xff]   ;;  %v5080_v39 = vld [vmem:[%s6247_s7 + $0x30] sm:$0xff]   ;;  %v5081_v40 = vld [vmem:[%s6247_s7 + $0x28] sm:$0xff]   ;;  %s4170_s5 = sshll.u32 %s738_s3, 4  ;;  %s6140_s5 = int_to_ptr.vmem [resolvable:$true] %s4170_s5 }
  0x2c   : > { %v5082_v41 = vld [vmem:[%s6247_s7 + $0x38] sm:$0xff]   ;;  %v4241_v8 = vld [vmem:[%s6249_s2] ss:$0 sm:$0xff]  ;;  %v4242_v10 = vld [vmem:[%s6249_s2 + $0x1] ss:$0 sm:$0xff]  ;;  %s5171_s6 = scalar_lea.vmem %s6140_s5, 16 }
  0x2d   : > { %p5172_p11 = scmp.ne.s32.totalorder %s6140_s5, %s5171_s6 }
  0x2e   : > { %v4240_v18 = vld [vmem:[%s6244_s4] ss:$0 sm:$0xff]  ;;  %s6245_s4 = sld [smem:[#allocation17_spill]] }
  0x2f   : > { %p5173_p12 = pnand %p5172_p11, %p5401_p5 }
  0x31   : > { %p5174_p13 = pneg %p5173_p12 }
  0x34   : > { %v5067_v26 = vld [vmem:[%s6245_s4] sm:$0xff]   ;;  %v5068_v27 = vld [vmem:[%s6245_s4 + $0x10] sm:$0xff]   ;;  %v5069_v28 = vld [vmem:[%s6245_s4 + $0x8] sm:$0xff]  }
  0x35   : > { %v5070_v29 = vld [vmem:[%s6245_s4 + $0x18] sm:$0xff]   ;;  %v5071_v30 = vld [vmem:[%s6245_s4 + $0x20] sm:$0xff]   ;;  %v5072_v31 = vld [vmem:[%s6245_s4 + $0x30] sm:$0xff]  }
  0x36   : > { %v5073_v32 = vld [vmem:[%s6245_s4 + $0x28] sm:$0xff]   ;;  %v5074_v33 = vld [vmem:[%s6245_s4 + $0x38] sm:$0xff]  }
  0xb8   : > { %v754_v2 = vpop.xlane.xlu0 %753 }
  0xb9   : > { %v756_v3 = vmul.f32 0.03125, %v754_v2 }
  0xbb   : > { %v757_v4 = vsub.f32 %v748_v0, %v756_v3 }
  0xbd   : > { %v758_v5 = vmul.f32 %v757_v4, %v757_v4 }
  0xbf   : > { %v759_v6 = vsel %vm751_vm0, %v758_v5, 0.0 }
  0xc0   : > { %760 = vadd.xlane.f32.xlu0 %v759_v6 }
 0x14d   : > { %v761_v12 = vpop.xlane.xlu0 %760 }
 0x14e   : > { %v762_v13 = vmul.f32 0.03125, %v761_v12 }
 0x150   : > { %v763_v14 = vadd.f32 1e-12, %v762_v13  ;;  %v4259_v13 = vld [vmem:[%s6248_s1 + $0x2] ss:$0 sm:$0xff] }
 0x152   : > { %5123 = vrsqrt.f32 %v763_v14  ;;  %v4260_v14 = vld [vmem:[%s6248_s1 + $0x3] ss:$0 sm:$0xff] }
 0x15c   : > { %v5124_v15 = vpop.eup %5123 }
 0x15d   : > { %v765_v17 = vmul.f32 %v5124_v15, %v757_v4 }
 0x15f   : > { %v772_v19 = vmul.f32 %v4239_v16, %v765_v17 }
 0x161   : > { %v5449_v20 = vadd.f32 %v4240_v18, %v772_v19 }
 0x163   : > { %v5459_v23 = vpack.c.bf16 %v5449_v20, %v5449_v20 }
 0x165   : > { %4631 = vmatmul.mubr.msk.bf16.vlgmr.msra.gmra.mrb[0].mxu0 %vm751_vm0, %v5459_v23  ;;  %4639 = vmatmul.mubr.msk.bf16.vlgmr.msra.gmra.mrb[0].mxu1 %vm751_vm0, %v5459_v23 }
 0x166   : > { %4643 = vmatpush3.bf16.msra.mxu0 %v5063_v21  ;;  %4651 = vmatpush3.bf16.msra.mxu1 %v5064_v22 }
 0x167   : > { %4644 = vmatprep.subr.bf16.mxu0 %v5235_v9  ;;  %4652 = vmatprep.subr.bf16.mxu1 %v5235_v9 }
 0x168   : > { %4646 = vmatprep.mubr.msk.bf16.mxu0 %vm5236_vm1, %v5235_v9  ;;  %4654 = vmatprep.mubr.msk.bf16.mxu1 %vm5236_vm1, %v5235_v9 }
 0x16a   : > { %4645 = vmatpush3.bf16.msra.mxu0 %v5065_v24  ;;  %4653 = vmatpush3.bf16.msra.mxu1 %v5066_v25 }
 0x16b   : > { %4658 = vmatprep.subr.bf16.mxu0 %v5235_v9  ;;  %4666 = vmatprep.subr.bf16.mxu1 %v5235_v9 }
 0x16d   : > { %4647 = vmatmul.mubr.msk.bf16.vlgmr.msra.gmra.mrb[4].mxu0 %vm751_vm0, %v5459_v23  ;;  %4655 = vmatmul.mubr.msk.bf16.vlgmr.msra.gmra.mrb[4].mxu1 %vm751_vm0, %v5459_v23 }
 0x16e   : > { %4659 = vmatpush3.bf16.msra.mxu0 %v5067_v26  ;;  %4667 = vmatpush3.bf16.msra.mxu1 %v5068_v27 }
 0x16f   : > { %4660 = vmatprep.subr.bf16.mxu0 %v5235_v9  ;;  %4668 = vmatprep.subr.bf16.mxu1 %v5235_v9 }
 0x170   : > { %4662 = vmatprep.mubr.msk.bf16.mxu0 %vm5236_vm1, %v5235_v9  ;;  %4670 = vmatprep.mubr.msk.bf16.mxu1 %vm5236_vm1, %v5235_v9 }
 0x172   : > { %4661 = vmatpush3.bf16.msra.mxu0 %v5069_v28  ;;  %4669 = vmatpush3.bf16.msra.mxu1 %v5070_v29 }
 0x173   : > { %4674 = vmatprep.subr.bf16.mxu0 %v5235_v9  ;;  %4682 = vmatprep.subr.bf16.mxu1 %v5235_v9 }
 0x175   : > { %4663 = vmatmul.mubr.msk.bf16.vlgmr.msra.gmra.mrb[8].mxu0 %vm751_vm0, %v5459_v23  ;;  %4671 = vmatmul.mubr.msk.bf16.vlgmr.msra.gmra.mrb[8].mxu1 %vm751_vm0, %v5459_v23 }
 0x176   : > { %4675 = vmatpush3.bf16.msra.mxu0 %v5071_v30  ;;  %4683 = vmatpush3.bf16.msra.mxu1 %v5072_v31 }
 0x177   : > { %4676 = vmatprep.subr.bf16.mxu0 %v5235_v9  ;;  %4684 = vmatprep.subr.bf16.mxu1 %v5235_v9 }
 0x178   : > { %4678 = vmatprep.mubr.msk.bf16.mxu0 %vm5236_vm1, %v5235_v9  ;;  %4686 = vmatprep.mubr.msk.bf16.mxu1 %vm5236_vm1, %v5235_v9 }
 0x17a   : > { %4677 = vmatpush3.bf16.msra.mxu0 %v5073_v32  ;;  %4685 = vmatpush3.bf16.msra.mxu1 %v5074_v33  ;;  %v4243_v32 = vld [vmem:[%s6249_s2 + $0x2] ss:$0 sm:$0xff]  ;;  %v4244_v33 = vld [vmem:[%s6249_s2 + $0x3] ss:$0 sm:$0xff] }
 0x17b   : > { %4690 = vmatprep.subr.bf16.mxu0 %v5235_v9  ;;  %4698 = vmatprep.subr.bf16.mxu1 %v5235_v9 }
 0x17d   : > { %4679 = vmatmul.mubr.msk.bf16.vlgmr.msra.gmra.mrb[12].mxu0 %vm751_vm0, %v5459_v23  ;;  %4687 = vmatmul.mubr.msk.bf16.vlgmr.msra.gmra.mrb[12].mxu1 %vm751_vm0, %v5459_v23 }
 0x17e   : > { %4691 = vmatpush3.bf16.msra.mxu0 %v5075_v34  ;;  %4699 = vmatpush3.bf16.msra.mxu1 %v5076_v35 }
 0x17f   : > { %4692 = vmatprep.subr.bf16.mxu0 %v5235_v9  ;;  %4700 = vmatprep.subr.bf16.mxu1 %v5235_v9 }
 0x180   : > { %4694 = vmatprep.mubr.msk.bf16.mxu0 %vm5236_vm1, %v5235_v9  ;;  %4702 = vmatprep.mubr.msk.bf16.mxu1 %vm5236_vm1, %v5235_v9 }
 0x182   : > { %4693 = vmatpush3.bf16.msra.mxu0 %v5077_v36  ;;  %4701 = vmatpush3.bf16.msra.mxu1 %v5078_v37  ;;  %v4273_v36 = vld [vmem:[%s6189_s9] ss:$0 sm:$0xff]  ;;  %v4274_v37 = vld [vmem:[%s6189_s9 + $0x1] ss:$0 sm:$0xff] }
 0x183   : > { %4706 = vmatprep.subr.bf16.mxu0 %v5235_v9  ;;  %4714 = vmatprep.subr.bf16.mxu1 %v5235_v9 }
 0x185   : > { %4695 = vmatmul.mubr.msk.bf16.vlgmr.msra.gmra.mrb[16].mxu0 %vm751_vm0, %v5459_v23  ;;  %4703 = vmatmul.mubr.msk.bf16.vlgmr.msra.gmra.mrb[16].mxu1 %vm751_vm0, %v5459_v23 }
 0x186   : > { %4707 = vmatpush3.bf16.msra.mxu0 %v5079_v38  ;;  %4715 = vmatpush3.bf16.msra.mxu1 %v5080_v39 }
 0x187   : > { %4708 = vmatprep.subr.bf16.mxu0 %v5235_v9  ;;  %4716 = vmatprep.subr.bf16.mxu1 %v5235_v9 }
 0x188   : > { %4710 = vmatprep.mubr.msk.bf16.mxu0 %vm5236_vm1, %v5235_v9  ;;  %4718 = vmatprep.mubr.msk.bf16.mxu1 %vm5236_vm1, %v5235_v9 }
 0x18a   : > { %4709 = vmatpush3.bf16.msra.mxu0 %v5081_v40  ;;  %4717 = vmatpush3.bf16.msra.mxu1 %v5082_v41 }
 0x18b   : > { %4722 = vmatprep.subr.bf16.mxu0 %v5235_v9  ;;  %4728 = vmatprep.subr.bf16.mxu1 %v5235_v9 }
 0x18d   : > { %4711 = vmatmul.mubr.msk.bf16.vlgmr.msra.gmra.mrb[20].mxu0 %vm751_vm0, %v5459_v23  ;;  %4719 = vmatmul.mubr.msk.bf16.vlgmr.msra.gmra.mrb[20].mxu1 %vm751_vm0, %v5459_v23 }
 0x18e   : > { %4724 = vmatprep.mubr.msk.bf16.mxu0 %vm5236_vm1, %v5235_v9  ;;  %4730 = vmatprep.mubr.msk.bf16.mxu1 %vm5236_vm1, %v5235_v9 }
 0x238   : > { %v874_v42 = vpop.f32.mrb[0].mxu0  ;;  %v926_v43 = vpop.f32.mrb[0].mxu1 }
 0x239   : > { %v4632_v44 = vpop.f32.mrb[1].mxu0  ;;  %v4640_v45 = vpop.f32.mrb[1].mxu1  ;;  %v875_v15 = vadd.f32 %v4241_v8, %v874_v42  ;;  %v927_v16 = vadd.f32 %v4242_v10, %v926_v43 }
 0x23a   : > { %v877_v46 = vpop.f32.mrb[2].mxu0  ;;  %v929_v47 = vpop.f32.mrb[2].mxu1 }
 0x23b   : > { %v4633_v48 = vpop.f32.mrb[3].mxu0  ;;  %v4641_v49 = vpop.f32.mrb[3].mxu1  ;;  %v1540_v26 = vpack.c.bf16 %v875_v15, %v875_v15  ;;  %v1541_v27 = vpack.c.bf16 %v927_v16, %v927_v16 }
 0x240   : > { %v978_v50 = vpop.f32.mrb[4].mxu0  ;;  %v1030_v51 = vpop.f32.mrb[4].mxu1 }
 0x241   : > { %v4648_v52 = vpop.f32.mrb[5].mxu0  ;;  %v4656_v53 = vpop.f32.mrb[5].mxu1  ;;  %v979_v38 = vadd.f32 %v4243_v32, %v978_v50  ;;  %v1031_v39 = vadd.f32 %v4244_v33, %v1030_v51 }
 0x242   : > { %v981_v54 = vpop.f32.mrb[6].mxu0  ;;  %v1033_v55 = vpop.f32.mrb[6].mxu1 }
 0x243   : > { %v4649_v56 = vpop.f32.mrb[7].mxu0  ;;  %v4657_v57 = vpop.f32.mrb[7].mxu1  ;;  %v1542_v48 = vpack.c.bf16 %v979_v38, %v979_v38  ;;  %v1543_v49 = vpack.c.bf16 %v1031_v39, %v1031_v39 }
 0x248   : > { %v1126_v60 = vpop.f32.mrb[8].mxu0  ;;  %v1178_v61 = vpop.f32.mrb[8].mxu1 }
 0x249   : > { %v1127_v62 = vadd.f32 %v4257_v58, %v1126_v60  ;;  %v1179_v63 = vadd.f32 %v4258_v59, %v1178_v61  ;;  %v4664_v0 = vpop.f32.mrb[9].mxu0  ;;  %v4672_v1 = vpop.f32.mrb[9].mxu1 }
 0x24a   : > { %v1129_v2 = vpop.f32.mrb[10].mxu0  ;;  %v1181_v3 = vpop.f32.mrb[10].mxu1  ;;  %v5645_v0 = vld [vmem:[%s745_s25] ss:$0 sm:$0xff] }
 0x24b   : > { %v1544_v4 = vpack.c.bf16 %v1127_v62, %v1127_v62  ;;  %v1545_v5 = vpack.c.bf16 %v1179_v63, %v1179_v63  ;;  %v4665_v6 = vpop.f32.mrb[11].mxu0  ;;  %v4673_v7 = vpop.f32.mrb[11].mxu1 }
 0x24d   : > { %v1559_v11 = vsel %vm1554_vm2, %v1544_v4, 0  ;;  %v1605_v12 = vsel %vm1554_vm2, %v1545_v5, 0 }
 0x24e   : > { %4723 = vmatpush3.bf16.xpose.msra.mxu0 %v1559_v11  ;;  %4729 = vmatpush3.bf16.xpose.msra.mxu1 %v1605_v12 }
 0x24f   : > { %4734 = vmatprep.subr.bf16.mxu0 %v5235_v9  ;;  %4740 = vmatprep.subr.bf16.mxu1 %v5235_v9 }
 0x250   : > { %v1230_v17 = vpop.f32.mrb[12].mxu0  ;;  %v1282_v18 = vpop.f32.mrb[12].mxu1 }
 0x251   : > { %v1231_v19 = vadd.f32 %v4259_v13, %v1230_v17  ;;  %v1283_v21 = vadd.f32 %v4260_v14, %v1282_v18  ;;  %v4680_v22 = vpop.f32.mrb[13].mxu0  ;;  %v4688_v23 = vpop.f32.mrb[13].mxu1 }
 0x252   : > { %v1233_v24 = vpop.f32.mrb[14].mxu0  ;;  %v1285_v25 = vpop.f32.mrb[14].mxu1 }
 0x253   : > { %v1546_v28 = vpack.c.bf16 %v1231_v19, %v1231_v19  ;;  %v1547_v29 = vpack.c.bf16 %v1283_v21, %v1283_v21  ;;  %v4681_v30 = vpop.f32.mrb[15].mxu0  ;;  %v4689_v31 = vpop.f32.mrb[15].mxu1 }
 0x255   : > { %v1651_v34 = vsel %vm1554_vm2, %v1546_v28, 0  ;;  %v1697_v35 = vsel %vm1554_vm2, %v1547_v29, 0  ;;  %4725 = vmatmul.mubr.msk.bf16.vlgmr.msra.gmra.mrb[24].mxu0 %vm1554_vm2, %v1540_v26  ;;  %4731 = vmatmul.mubr.msk.bf16.vlgmr.msra.gmra.mrb[24].mxu1 %vm1554_vm2, %v1541_v27 }
 0x256   : > { %4735 = vmatpush3.bf16.xpose.msra.mxu0 %v1651_v34  ;;  %4741 = vmatpush3.bf16.xpose.msra.mxu1 %v1697_v35 }
 0x257   : > { %4736 = vmatprep.mubr.msk.bf16.mxu0 %vm5236_vm1, %v5235_v9  ;;  %4742 = vmatprep.mubr.msk.bf16.mxu1 %vm5236_vm1, %v5235_v9 }
 0x258   : > { %v1378_v40 = vpop.f32.mrb[16].mxu0  ;;  %v1430_v41 = vpop.f32.mrb[16].mxu1  ;;  %4746 = vmatprep.subr.bf16.mxu0 %v5235_v9  ;;  %4752 = vmatprep.subr.bf16.mxu1 %v5235_v9 }
 0x259   : > { %v1379_v42 = vadd.f32 %v4273_v36, %v1378_v40  ;;  %v1431_v43 = vadd.f32 %v4274_v37, %v1430_v41  ;;  %v4696_v44 = vpop.f32.mrb[17].mxu0  ;;  %v4704_v45 = vpop.f32.mrb[17].mxu1 }
 0x25a   : > { %v1381_v46 = vpop.f32.mrb[18].mxu0  ;;  %v1433_v47 = vpop.f32.mrb[18].mxu1 }
 0x25b   : > { %v1787_v50 = vpack.c.bf16 %v1379_v42, %v1379_v42  ;;  %v1788_v51 = vpack.c.bf16 %v1431_v43, %v1431_v43  ;;  %v4697_v52 = vpop.f32.mrb[19].mxu0  ;;  %v4705_v53 = vpop.f32.mrb[19].mxu1 }
 0x25c   : > { %v4276_v52 = vld [vmem:[%s6189_s9 + $0x3] ss:$0 sm:$0xff] }
 0x25d   : > { %v1796_v54 = vsel %vm1794_vm3, %v1787_v50, 0  ;;  %v1842_v55 = vsel %vm1794_vm3, %v1788_v51, 0  ;;  %4737 = vmatmul.mubr.msk.bf16.vlgmr.msra.gmra.mrb[28].mxu0 %vm1554_vm2, %v1542_v48  ;;  %4743 = vmatmul.mubr.msk.bf16.vlgmr.msra.gmra.mrb[28].mxu1 %vm1554_vm2, %v1543_v49  ;;  %v4275_v49 = vld [vmem:[%s6189_s9 + $0x2] ss:$0 sm:$0xff] }
 0x25e   : > { %4747 = vmatpush3.bf16.msra.mxu0 %v1796_v54  ;;  %4753 = vmatpush3.bf16.msra.mxu1 %v1842_v55 }
 0x25f   : > { %4748 = vmatprep.mubr.msk.bf16.mxu0 %vm5236_vm1, %v5235_v9  ;;  %4758 = vmatprep.subr.bf16.mxu0 %v5235_v9 }
 0x260   : > { %v5634_v56 = vpop.f32.mrb[20].mxu0  ;;  %v5636_v57 = vpop.f32.mrb[20].mxu1  ;;  %4754 = vmatprep.mubr.msk.bf16.mxu1 %vm5236_vm1, %v5235_v9  ;;  %4764 = vmatprep.subr.bf16.mxu1 %v5235_v9 }
 0x261   : > { %v4712_v58 = vpop.f32.mrb[21].mxu0  ;;  %v4720_v59 = vpop.f32.mrb[21].mxu1  ;;  %v1483_v50 = vadd.f32 %v4275_v49, %v5634_v56 }
 0x262   : > { %v1485_v60 = vpop.f32.mrb[22].mxu0  ;;  %v1537_v61 = vpop.f32.mrb[22].mxu1  ;;  %v1535_v58 = vadd.f32 %v4276_v52, %v5636_v57 }
 0x263   : > { %v4713_v62 = vpop.f32.mrb[23].mxu0  ;;  %v4721_v63 = vpop.f32.mrb[23].mxu1  ;;  %v1789_v55 = vpack.c.bf16 %v1483_v50, %v1483_v50 }
 0x264   : > { %v1790_v63 = vpack.c.bf16 %v1535_v58, %v1535_v58 }
 0x265   : > { %v1888_v62 = vsel %vm1794_vm3, %v1789_v55, 0 }
 0x266   : > { %v1934_v57 = vsel %vm1794_vm3, %v1790_v63, 0 }
 0x328   : > { %v1595_v1 = vpop.f32.mrb[24].mxu0  ;;  %v1641_v2 = vpop.f32.mrb[24].mxu1 }
 0x329   : > { %v1596_v3 = vadd.f32 %v5645_v0, %v1595_v1  ;;  %v4726_v4 = vpop.f32.mrb[25].mxu0  ;;  %v4732_v5 = vpop.f32.mrb[25].mxu1  ;;  %v1642_v8 = vadd.f32 %v5645_v0, %v1641_v2 }
 0x32a   : > { %v1598_v6 = vpop.f32.mrb[26].mxu0  ;;  %v1644_v7 = vpop.f32.mrb[26].mxu1  ;;  %v1980_v4 = vld [vmem:[%s6190_s10] sm:$0xf] }
 0x32b   : > { %v4727_v10 = vpop.f32.mrb[27].mxu0  ;;  %v4733_v11 = vpop.f32.mrb[27].mxu1  ;;  %v1739_v12 = vsel %vm1554_vm2, %v1596_v3, -inf  ;;  %v1742_v13 = vsel %vm1554_vm2, %v1642_v8, -inf }
 0x32c   : > { %1740 = vmax.xlane.f32.xlu1 %v1739_v12  ;;  %v1981_v11 = vld [vmem:[%s6190_s10 + $0x4] sm:$0xf] }
 0x32d   : > { %v2034_v12 = vsel %vm1794_vm3, %v1981_v11, 0 }
 0x330   : > { %v1733_v14 = vpop.f32.mrb[28].mxu1  ;;  %1743 = vmax.xlane.f32.xlu1 %v1742_v13  ;;  %v1687_v15 = vpop.f32.mrb[28].mxu0  ;;  %v1982_v13 = vld [vmem:[%s6190_s10 + $0x8] sm:$0xf] }
 0x331   : > { %v1734_v16 = vadd.f32 %v5645_v0, %v1733_v14  ;;  %v1688_v17 = vadd.f32 %v5645_v0, %v1687_v15  ;;  %v4738_v18 = vpop.f32.mrb[29].mxu0  ;;  %v4744_v19 = vpop.f32.mrb[29].mxu1 }
 0x332   : > { %v1690_v21 = vpop.f32.mrb[30].mxu0  ;;  %v1736_v22 = vpop.f32.mrb[30].mxu1  ;;  %v1983_v19 = vld [vmem:[%s6190_s10 + $0xc] sm:$0xf] }
 0x333   : > { %v4739_v23 = vpop.f32.mrb[31].mxu0  ;;  %v4745_v24 = vpop.f32.mrb[31].mxu1  ;;  %v1748_v25 = vsel %vm1554_vm2, %v1734_v16, -inf  ;;  %v1745_v26 = vsel %vm1554_vm2, %v1688_v17, -inf }
 0x334   : > { %1749 = vmax.xlane.f32.xlu1 %v1748_v25  ;;  %1746 = vmax.xlane.f32.xlu0 %v1745_v26  ;;  %v2126_v25 = vsel %vm1794_vm3, %v1983_v19, 0  ;;  %v5085_v19 = vld [vmem:[%s6196_s16] sm:$0xff]  }
 0x3b9   : > { %v1741_v27 = vpop.xlane.xlu1 %1740 }
 0x3ba   : > { %v1751_v28 = vsub.f32 %v1596_v3, %v1741_v27 }
 0x3bc   : > { %v1755_v29 = vmul.f32 1.442695, %v1751_v28 }
 0x3bd   : > { %v1744_v30 = vpop.xlane.xlu1 %1743 }
 0x3be   : > { %5125 = vpow2.f32 %v1755_v29  ;;  %v1752_v31 = vsub.f32 %v1642_v8, %v1744_v30  ;;  %v1988_v8 = vsel %vm1794_vm3, %v1980_v4, 0 }
 0x3c0   : > { %v1757_v32 = vmul.f32 1.442695, %v1752_v31 }
 0x3c1   : > { %v1750_v33 = vpop.xlane.xlu1 %1749  ;;  %v1747_v34 = vpop.xlane.xlu0 %1746 }
 0x3c2   : > { %5127 = vpow2.f32 %v1757_v32  ;;  %v1754_v35 = vsub.f32 %v1734_v16, %v1750_v33  ;;  %v1753_v36 = vsub.f32 %v1688_v17, %v1747_v34  ;;  %v2080_v17 = vsel %vm1794_vm3, %v1982_v13, 0  ;;  %v4303_v13 = vld [vmem:[%s6192_s12] ss:$0 sm:$0xff] }
 0x3c4   : > { %v1761_v37 = vmul.f32 1.442695, %v1754_v35  ;;  %v1759_v38 = vmul.f32 1.442695, %v1753_v36 }
 0x3c6   : > { %5129 = vpow2.f32 %v1761_v37 }
 0x3c7   : > { %5131 = vpow2.f32 %v1759_v38 }
 0x3c8   : > { %v5126_v39 = vpop.eup %5125 }
 0x3c9   : > { %v1763_v40 = vsel %vm1554_vm2, %v5126_v39, 0.0 }
 0x3ca   : > { %1764 = vadd.xlane.f32.xlu0 %v1763_v40 }
 0x3cc   : > { %v5128_v41 = vpop.eup %5127 }
 0x3cd   : > { %v1766_v42 = vsel %vm1554_vm2, %v5128_v41, 0.0 }
 0x3ce   : > { %1767 = vadd.xlane.f32.xlu1 %v1766_v42 }
 0x3d0   : > { %v5130_v43 = vpop.eup %5129 }
 0x3d1   : > { %v5132_v44 = vpop.eup %5131  ;;  %v1772_v45 = vsel %vm1554_vm2, %v5130_v43, 0.0 }
 0x3d2   : > { %1773 = vadd.xlane.f32.xlu1 %v1772_v45  ;;  %v1769_v46 = vsel %vm1554_vm2, %v5132_v44, 0.0 }
 0x3d3   : > { %1770 = vadd.xlane.f32.xlu0 %v1769_v46 }
 0x457   : > { %v1765_v47 = vpop.xlane.xlu0 %1764 }
 0x458   : > { %5133 = vrcp.f32 %v1765_v47 }
 0x45b   : > { %v1768_v48 = vpop.xlane.xlu1 %1767 }
 0x45c   : > { %5135 = vrcp.f32 %v1768_v48 }
 0x45f   : > { %v1774_v51 = vpop.xlane.xlu1 %1773 }
 0x460   : > { %5137 = vrcp.f32 %v1774_v51  ;;  %v1771_v53 = vpop.xlane.xlu0 %1770 }
 0x461   : > { %5139 = vrcp.f32 %v1771_v53 }
 0x462   : > { %v5134_v54 = vpop.eup %5133 }
 0x463   : > { %v1779_v59 = vmul.f32 %v5134_v54, %v5126_v39 }
 0x465   : > { %v1783_v60 = vpack.c.bf16 %v1779_v59, %v1779_v59  ;;  %v4302_v59 = vld [vmem:[%s6191_s11] ss:$0 sm:$0xff] }
 0x466   : > { %v5136_v61 = vpop.eup %5135 }
 0x467   : > { %v1780_v1 = vmul.f32 %v5136_v61, %v5128_v41  ;;  %4749 = vmatmul.mubr.msk.bf16.vlgmr.msra.gmra.mrb[32].mxu0 %vm1554_vm2, %v1783_v60 }
 0x468   : > { %4759 = vmatpush3.bf16.msra.mxu0 %v1888_v62  ;;  %4760 = vmatprep.mubr.msk.bf16.mxu0 %vm5236_vm1, %v5235_v9 }
 0x469   : > { %v1784_v56 = vpack.c.bf16 %v1780_v1, %v1780_v1  ;;  %4770 = vmatprep.subr.bf16.mxu0 %v5235_v9 }
 0x46a   : > { %v5138_v2 = vpop.eup %5137 }
 0x46b   : > { %v5140_v3 = vpop.eup %5139  ;;  %4755 = vmatmul.mubr.msk.bf16.vlgmr.msra.gmra.mrb[32].mxu1 %vm1554_vm2, %v1784_v56  ;;  %v1782_v6 = vmul.f32 %v5138_v2, %v5130_v43 }
 0x46c   : > { %v1781_v5 = vmul.f32 %v5140_v3, %v5132_v44  ;;  %4765 = vmatpush3.bf16.msra.mxu1 %v1934_v57  ;;  %4766 = vmatprep.mubr.msk.bf16.mxu1 %vm5236_vm1, %v5235_v9 }
 0x46d   : > { %4776 = vmatprep.subr.bf16.mxu1 %v5235_v9  ;;  %v1786_v10 = vpack.c.bf16 %v1782_v6, %v1782_v6 }
 0x46e   : > { %v1785_v7 = vpack.c.bf16 %v1781_v5, %v1781_v5 }
 0x470   : > { %4761 = vmatmul.mubr.msk.bf16.vlgmr.msra.gmra.mrb[36].mxu0 %vm1554_vm2, %v1785_v7  ;;  %v5083_v7 = vld [vmem:[%s6194_s14] sm:$0xff]  }
 0x471   : > { %4771 = vmatpush3.bf16.msra.mxu0 %v1988_v8  ;;  %4772 = vmatprep.mubr.msk.bf16.mxu0 %vm5236_vm1, %v5235_v9  ;;  %v5084_v8 = vld [vmem:[%s6194_s14 + $0x8] sm:$0xff]  }
 0x472   : > { %4782 = vmatprep.subr.bf16.mxu0 %v5235_v9 }
 0x473   : > { %4767 = vmatmul.mubr.msk.bf16.vlgmr.msra.gmra.mrb[36].mxu1 %vm1554_vm2, %v1786_v10 }
 0x474   : > { %4778 = vmatprep.mubr.msk.bf16.mxu1 %vm5236_vm1, %v5235_v9  ;;  %4777 = vmatpush3.bf16.msra.mxu1 %v2034_v12 }
 0x475   : > { %4788 = vmatprep.subr.bf16.mxu1 %v5235_v9 }
 0x53a   : > { %v1832_v14 = vpop.f32.mrb[32].mxu0 }
 0x53b   : > { %v1976_v15 = vpack.c.bf16 %v1832_v14, %v1832_v14  ;;  %v4750_v16 = vpop.f32.mrb[33].mxu0 }
 0x53c   : > { %v1835_v18 = vpop.f32.mrb[34].mxu0 }
 0x53d   : > { %v4751_v21 = vpop.f32.mrb[35].mxu0  ;;  %4773 = vmatmul.mubr.msk.bf16.vlgmr.msra.gmra.mrb[40].mxu0 %vm1554_vm2, %v1976_v15  ;;  %v4304_v15 = vld [vmem:[%s6193_s13] ss:$0 sm:$0xff] }
 0x53e   : > { %v1878_v22 = vpop.f32.mrb[32].mxu1  ;;  %4783 = vmatpush3.bf16.msra.mxu0 %v2080_v17  ;;  %4784 = vmatprep.mubr.msk.bf16.mxu0 %vm5236_vm1, %v5235_v9  ;;  %v5086_v21 = vld [vmem:[%s6196_s16 + $0x8] sm:$0xff]  }
 0x53f   : > { %v1977_v23 = vpack.c.bf16 %v1878_v22, %v1878_v22  ;;  %v4756_v24 = vpop.f32.mrb[33].mxu1  ;;  %4794 = vmatprep.subr.bf16.mxu0 %v5235_v9  ;;  %v5087_v22 = vld [vmem:[%s6196_s16 + $0x10] sm:$0xff]  }
 0x540   : > { %v1881_v26 = vpop.f32.mrb[34].mxu1  ;;  %v4305_v24 = vld [vmem:[%s6195_s15] ss:$0 sm:$0xff] }
 0x541   : > { %v4757_v27 = vpop.f32.mrb[35].mxu1  ;;  %4779 = vmatmul.mubr.msk.bf16.vlgmr.msra.gmra.mrb[40].mxu1 %vm1554_vm2, %v1977_v23  ;;  %v5088_v23 = vld [vmem:[%s6196_s16 + $0x18] sm:$0xff]  }
 0x542   : > { %4789 = vmatpush3.bf16.msra.mxu1 %v2126_v25  ;;  %4790 = vmatprep.mubr.msk.bf16.mxu1 %vm5236_vm1, %v5235_v9 }
 0x543   : > { %v1924_v28 = vpop.f32.mrb[36].mxu0  ;;  %4802 = vmatprep.subr.bf16.mxu1 %v5235_v9 }
 0x544   : > { %v1978_v29 = vpack.c.bf16 %v1924_v28, %v1924_v28  ;;  %v4762_v30 = vpop.f32.mrb[37].mxu0 }
 0x545   : > { %v1927_v31 = vpop.f32.mrb[38].mxu0 }
 0x546   : > { %v4763_v32 = vpop.f32.mrb[39].mxu0  ;;  %4785 = vmatmul.mubr.msk.bf16.vlgmr.msra.gmra.mrb[44].mxu0 %vm1554_vm2, %v1978_v29  ;;  %v1970_v33 = vpop.f32.mrb[36].mxu1 }
 0x547   : > { %v1979_v34 = vpack.c.bf16 %v1970_v33, %v1970_v33  ;;  %v4768_v35 = vpop.f32.mrb[37].mxu1  ;;  %4798 = vmatprep.mubr.msk.bf16.mxu0 %vm5236_vm1, %v5235_v9  ;;  %4795 = vmatpush3.bf16.msra.mxu0 %v5083_v7  ;;  %v5096_v7 = vld [vmem:[%s6245_s4 + $0x48] sm:$0xff]  }
 0x548   : > { %v1973_v36 = vpop.f32.mrb[38].mxu1  ;;  %4796 = vmatprep.subr.bf16.mxu0 %v5235_v9 }
 0x549   : > { %v4769_v37 = vpop.f32.mrb[39].mxu1  ;;  %4791 = vmatmul.mubr.msk.bf16.vlgmr.msra.gmra.mrb[44].mxu1 %vm1554_vm2, %v1979_v34 }
 0x54a   : > { %4810 = vmatprep.mubr.msk.bf16.mxu1 %vm5236_vm1, %v5235_v9  ;;  %4803 = vmatpush3.bf16.msra.mxu1 %v5085_v19  ;;  %v5108_v19 = vld [vmem:[%s6247_s7 + $0x68] sm:$0xff]  }
 0x54b   : > { %4797 = vmatpush3.bf16.msra.mxu0 %v5084_v8  ;;  %4804 = vmatprep.subr.bf16.mxu1 %v5235_v9  ;;  %v5097_v8 = vld [vmem:[%s6242_s29 + $0x70] sm:$0xff]  }
 0x54c   : > { %4814 = vmatprep.subr.bf16.mxu0 %v5235_v9 }
 0x54e   : > { %4805 = vmatpush3.bf16.msra.mxu1 %v5086_v21  ;;  %v5109_v21 = vld [vmem:[%s6247_s7 + $0x50] sm:$0xff]  }
 0x54f   : > { %4806 = vmatprep.subr.bf16.mxu1 %v5235_v9 }
 0x552   : > { %4807 = vmatpush3.bf16.msra.mxu1 %v5087_v22  ;;  %v5110_v22 = vld [vmem:[%s6247_s7 + $0x58] sm:$0xff]  }
 0x553   : > { %4808 = vmatprep.subr.bf16.mxu1 %v5235_v9 }
 0x556   : > { %4809 = vmatpush3.bf16.msra.mxu1 %v5088_v23  ;;  %v5111_v23 = vld [vmem:[%s6247_s7 + $0x70] sm:$0xff]  }
 0x557   : > { %4830 = vmatprep.subr.bf16.mxu1 %v5235_v9 }
 0x610   : > { %v2024_v38 = vpop.f32.mrb[40].mxu0 }
 0x611   : > { %v4774_v39 = vpop.f32.mrb[41].mxu0  ;;  %v2168_v43 = vsel %vm751_vm0, %v2024_v38, 0.0 }
 0x612   : > { %v2027_v40 = vpop.f32.mrb[42].mxu0 }
 0x613   : > { %v4775_v41 = vpop.f32.mrb[43].mxu0  ;;  %v4309_v40 = vld [vmem:[%s6197_s17] ss:$0 sm:$0xff] }
 0x614   : > { %v2070_v42 = vpop.f32.mrb[40].mxu1 }
 0x615   : > { %v2169_v44 = vsel %vm751_vm0, %v2070_v42, 0.0  ;;  %v4780_v45 = vpop.f32.mrb[41].mxu1 }
 0x616   : > { %v2170_v46 = vadd.f32 %v2169_v44, %v2168_v43  ;;  %v2073_v47 = vpop.f32.mrb[42].mxu1 }
 0x617   : > { %v4781_v48 = vpop.f32.mrb[43].mxu1 }
 0x619   : > { %v2116_v49 = vpop.f32.mrb[44].mxu0 }
 0x61a   : > { %v2171_v50 = vsel %vm751_vm0, %v2116_v49, 0.0  ;;  %v4786_v51 = vpop.f32.mrb[45].mxu0 }
 0x61b   : > { %v2172_v52 = vadd.f32 %v2171_v50, %v2170_v46  ;;  %v2119_v53 = vpop.f32.mrb[46].mxu0 }
 0x61c   : > { %v4787_v54 = vpop.f32.mrb[47].mxu0  ;;  %v2162_v55 = vpop.f32.mrb[44].mxu1  ;;  %v5089_v53 = vld [vmem:[%s6242_s29 + $0x40] sm:$0xff]  }
 0x61d   : > { %v2173_v58 = vsel %vm751_vm0, %v2162_v55, 0.0  ;;  %v4792_v60 = vpop.f32.mrb[45].mxu1  ;;  %v5090_v54 = vld [vmem:[%s6242_s29 + $0x60] sm:$0xff]   ;;  %v5091_v55 = vld [vmem:[%s6242_s29 + $0x48] sm:$0xff]  }
 0x61e   : > { %v2174_v61 = vadd.f32 %v2173_v58, %v2172_v52  ;;  %v2165_v62 = vpop.f32.mrb[46].mxu1  ;;  %v5092_v58 = vld [vmem:[%s6242_s29 + $0x68] sm:$0xff]  }
 0x61f   : > { %v4793_v63 = vpop.f32.mrb[47].mxu1 }
 0x620   : > { %v2182_v1 = vadd.f32 %v4302_v59, %v2174_v61  ;;  %v4315_v63 = vld [vmem:[%s6198_s18] ss:$0 sm:$0xff] }
 0x622   : > { %v2183_v56 = vadd.f32 %v2182_v1, %v5449_v20 }
 0x624   : > { %v2186_v2 = vsel %vm751_vm0, %v2183_v56, 0.0 }
 0x625   : > { %2187 = vadd.xlane.f32.xlu0 %v2186_v2 }
 0x6b2   : > { %v2188_v3 = vpop.xlane.xlu0 %2187 }
 0x6b3   : > { %v2189_v57 = vmul.f32 0.03125, %v2188_v3 }
 0x6b5   : > { %v2190_v4 = vsub.f32 %v2183_v56, %v2189_v57  ;;  %v4316_v56 = vld [vmem:[%s6199_s19] ss:$0 sm:$0xff]  ;;  %v5093_v57 = vld [vmem:[%s6242_s29 + $0x50] sm:$0xff]  }
 0x6b7   : > { %v2191_v5 = vmul.f32 %v2190_v4, %v2190_v4 }
 0x6b9   : > { %v2192_v6 = vsel %vm751_vm0, %v2191_v5, 0.0 }
 0x6ba   : > { %2193 = vadd.xlane.f32.xlu1 %v2192_v6  ;;  %v5095_v6 = vld [vmem:[%s6242_s29 + $0x58] sm:$0xff]  }
 0x747   : > { %v2194_v20 = vpop.xlane.xlu1 %2193 }
 0x748   : > { %v2195_v10 = vmul.f32 0.03125, %v2194_v20  ;;  %v5098_v20 = vld [vmem:[%s6245_s4 + $0x60] sm:$0xff]  }
 0x74a   : > { %v2196_v11 = vadd.f32 1e-12, %v2195_v10  ;;  %v5099_v10 = vld [vmem:[%s6242_s29 + $0x78] sm:$0xff]  }
 0x74c   : > { %5141 = vrsqrt.f32 %v2196_v11  ;;  %v5100_v11 = vld [vmem:[%s6245_s4 + $0x68] sm:$0xff]  }
 0x756   : > { %v5142_v12 = vpop.eup %5141 }
 0x757   : > { %v2198_v14 = vmul.f32 %v5142_v12, %v2190_v4  ;;  %v5094_v4 = vld [vmem:[%s6245_s4 + $0x40] sm:$0xff]   ;;  %v5101_v12 = vld [vmem:[%s6245_s4 + $0x50] sm:$0xff]  }
 0x759   : > { %v2205_v16 = vmul.f32 %v4303_v13, %v2198_v14  ;;  %v5102_v13 = vld [vmem:[%s6247_s7 + $0x40] sm:$0xff]   ;;  %v5103_v14 = vld [vmem:[%s6245_s4 + $0x58] sm:$0xff]  }
 0x75b   : > { %v2212_v17 = vadd.f32 %v4304_v15, %v2205_v16  ;;  %v5104_v15 = vld [vmem:[%s6247_s7 + $0x48] sm:$0xff]   ;;  %v5105_v16 = vld [vmem:[%s6245_s4 + $0x70] sm:$0xff]  }
 0x75d   : > { %v2213_v18 = vpack.c.bf16 %v2212_v17, %v2212_v17 }
 0x75f   : > { %4799 = vmatmul.mubr.msk.bf16.vlgmr.msra.gmra.mrb[48].mxu0 %vm751_vm0, %v2213_v18  ;;  %v5107_v18 = vld [vmem:[%s6245_s4 + $0x78] sm:$0xff]   ;;  %s5175_s4 = sshll.u32 %s5237_s27, 4  ;;  %s5176_s4 = int_to_ptr.vmem [resolvable:$false] %s5175_s4 }
 0x760   : > { %4818 = vmatprep.mubr.msk.bf16.mxu0 %vm5236_vm1, %v5235_v9  ;;  %4815 = vmatpush3.bf16.msra.mxu0 %v5089_v53  ;;  %s5177_s25 = scalar_lea.vmem %s5176_s4, 32  ;;  %p5178_p0 = scmp.lt.s32.totalorder %s6140_s5, %s5176_s4 }
 0x761   : > { %4816 = vmatprep.subr.bf16.mxu0 %v5235_v9  ;;  %p5179_p1 = scmp.lt.s32.totalorder %s5177_s25, %s5171_s6 }
 0x763   : > { %p5180_p2 = por %p5179_p1, %p5178_p0 }
 0x764   : > { %4817 = vmatpush3.bf16.msra.mxu0 %v5091_v55 }
 0x765   : > { %4822 = vmatprep.subr.bf16.mxu0 %v5235_v9  ;;  %p5181_p3 = pnand %p5180_p2, %p5174_p13 }
 0x832   : > { %v2274_v25 = vpop.f32.mrb[48].mxu0 }
 0x833   : > { %v2275_v26 = vadd.f32 %v4305_v24, %v2274_v25  ;;  %v4800_v27 = vpop.f32.mrb[49].mxu0  ;;  %v5112_v24 = vld [vmem:[%s6247_s7 + $0x78] sm:$0xff]  }
 0x834   : > { %v2277_v28 = vpop.f32.mrb[50].mxu0 }
 0x835   : > { %v2281_v29 = vmul.f32 0.044715, %v2275_v26  ;;  %v4801_v30 = vpop.f32.mrb[51].mxu0  ;;  %v2280_v36 = vmul.f32 0.5, %v2275_v26 }
 0x837   : > { %v2282_v31 = vmul.f32 %v2281_v29, %v2275_v26 }
 0x839   : > { %v2283_v32 = vmul.f32 %v2282_v31, %v2275_v26 }
 0x83b   : > { %v2284_v33 = vadd.f32 %v2283_v32, %v2275_v26 }
 0x83d   : > { %v2285_v34 = vmul.f32 0.7978846, %v2284_v33  ;;  %v4373_v33 = vld [vmem:[%s6248_s1 + $0x4] ss:$0 sm:$0xff] }
 0x83f   : > { %5143 = vtanh.f32 %v2285_v34 }
 0x849   : > { %v5144_v35 = vpop.eup %5143 }
 0x84a   : > { %v2287_v37 = vadd.f32 1.0, %v5144_v35 }
 0x84c   : > { %v2288_v38 = vmul.f32 %v2287_v37, %v2280_v36 }
 0x84e   : > { %v2289_v39 = vpack.c.bf16 %v2288_v38, %v2288_v38 }
 0x850   : > { %4811 = vmatmul.mubr.msk.bf16.vlgmr.msra.gmra.mrb[48].mxu1 %vm2329_vm4, %v2289_v39 }
 0x851   : > { %4834 = vmatprep.mubr.msk.bf16.mxu1 %vm5236_vm1, %v5235_v9  ;;  %4831 = vmatpush3.bf16.msra.mxu1 %v5090_v54 }
 0x852   : > { %4832 = vmatprep.subr.bf16.mxu1 %v5235_v9 }
 0x855   : > { %4833 = vmatpush3.bf16.msra.mxu1 %v5092_v58 }
 0x856   : > { %4846 = vmatprep.subr.bf16.mxu1 %v5235_v9 }
 0x923   : > { %v2367_v41 = vpop.f32.mrb[48].mxu1 }
 0x924   : > { %v2368_v42 = vadd.f32 %v4309_v40, %v2367_v41  ;;  %v4812_v43 = vpop.f32.mrb[49].mxu1 }
 0x925   : > { %v2370_v44 = vpop.f32.mrb[50].mxu1 }
 0x926   : > { %v4813_v45 = vpop.f32.mrb[51].mxu1  ;;  %v2373_v46 = vadd.f32 %v2368_v42, %v2212_v17  ;;  %v5106_v17 = vld [vmem:[%s6247_s7 + $0x60] sm:$0xff]  }
 0x927   : > { %v4337_v44 = vld [vmem:[%s6249_s2 + $0x4] ss:$0 sm:$0xff] }
 0x928   : > { %v2376_v47 = vsel %vm751_vm0, %v2373_v46, 0.0 }
 0x929   : > { %2377 = vadd.xlane.f32.xlu0 %v2376_v47 }
 0x9b6   : > { %v2378_v48 = vpop.xlane.xlu0 %2377 }
 0x9b7   : > { %v2379_v49 = vmul.f32 0.03125, %v2378_v48 }
 0x9b9   : > { %v2380_v50 = vsub.f32 %v2373_v46, %v2379_v49  ;;  %v4375_v46 = vld [vmem:[%s6248_s1 + $0x6] ss:$0 sm:$0xff] }
 0x9bb   : > { %v2381_v51 = vmul.f32 %v2380_v50, %v2380_v50 }
 0x9bd   : > { %v2382_v52 = vsel %vm751_vm0, %v2381_v51, 0.0 }
 0x9be   : > { %2383 = vadd.xlane.f32.xlu1 %v2382_v52 }
 0xa4b   : > { %v2384_v59 = vpop.xlane.xlu1 %2383 }
 0xa4c   : > { %v2385_v60 = vmul.f32 0.03125, %v2384_v59 }
 0xa4e   : > { %v2386_v61 = vadd.f32 1e-12, %v2385_v60 }
 0xa50   : > { %5145 = vrsqrt.f32 %v2386_v61  ;;  %v4339_v61 = vld [vmem:[%s6249_s2 + $0x6] ss:$0 sm:$0xff] }
 0xa5a   : > { %v5146_v62 = vpop.eup %5145 }
 0xa5b   : > { %v2388_v1 = vmul.f32 %v5146_v62, %v2380_v50 }
 0xa5d   : > { %v2395_v2 = vmul.f32 %v4315_v63, %v2388_v1  ;;  %v4374_v63 = vld [vmem:[%s6248_s1 + $0x5] ss:$0 sm:$0xff]  ;;  %v4409_v1 = vld [vmem:[%s6189_s9 + $0x4] ss:$0 sm:$0xff] }
 0xa5f   : > { %v5791_v3 = vadd.f32 %v4316_v56, %v2395_v2 }
 0xa61   : > { %v5801_v5 = vpack.c.bf16 %v5791_v3, %v5791_v3 }
 0xa63   : > { %4819 = vmatmul.mubr.msk.bf16.vlgmr.msra.gmra.mrb[52].mxu0 %vm751_vm0, %v5801_v5  ;;  %4835 = vmatmul.mubr.msk.bf16.vlgmr.msra.gmra.mrb[52].mxu1 %vm751_vm0, %v5801_v5 }
 0xa64   : > { %4823 = vmatpush3.bf16.msra.mxu0 %v5093_v57  ;;  %4847 = vmatpush3.bf16.msra.mxu1 %v5094_v4 }
 0xa65   : > { %4824 = vmatprep.subr.bf16.mxu0 %v5235_v9  ;;  %4848 = vmatprep.subr.bf16.mxu1 %v5235_v9 }
 0xa66   : > { %4826 = vmatprep.mubr.msk.bf16.mxu0 %vm5236_vm1, %v5235_v9  ;;  %4850 = vmatprep.mubr.msk.bf16.mxu1 %vm5236_vm1, %v5235_v9 }
 0xa68   : > { %4825 = vmatpush3.bf16.msra.mxu0 %v5095_v6  ;;  %4849 = vmatpush3.bf16.msra.mxu1 %v5096_v7 }
 0xa69   : > { %4838 = vmatprep.subr.bf16.mxu0 %v5235_v9  ;;  %4862 = vmatprep.subr.bf16.mxu1 %v5235_v9 }
 0xa6b   : > { %4827 = vmatmul.mubr.msk.bf16.vlgmr.msra.gmra.mrb[56].mxu0 %vm751_vm0, %v5801_v5  ;;  %4851 = vmatmul.mubr.msk.bf16.vlgmr.msra.gmra.mrb[56].mxu1 %vm751_vm0, %v5801_v5 }
 0xa6c   : > { %4839 = vmatpush3.bf16.msra.mxu0 %v5097_v8  ;;  %4863 = vmatpush3.bf16.msra.mxu1 %v5098_v20 }
 0xa6d   : > { %4840 = vmatprep.subr.bf16.mxu0 %v5235_v9  ;;  %4864 = vmatprep.subr.bf16.mxu1 %v5235_v9 }
 0xa6e   : > { %4842 = vmatprep.mubr.msk.bf16.mxu0 %vm5236_vm1, %v5235_v9  ;;  %4866 = vmatprep.mubr.msk.bf16.mxu1 %vm5236_vm1, %v5235_v9 }
 0xa70   : > { %4841 = vmatpush3.bf16.msra.mxu0 %v5099_v10  ;;  %4865 = vmatpush3.bf16.msra.mxu1 %v5100_v11 }
 0xa71   : > { %4854 = vmatprep.subr.bf16.mxu0 %v5235_v9  ;;  %4878 = vmatprep.subr.bf16.mxu1 %v5235_v9 }
 0xa73   : > { %4843 = vmatmul.mubr.msk.bf16.vlgmr.msra.gmra.mrb[60].mxu0 %vm751_vm0, %v5801_v5  ;;  %4867 = vmatmul.mubr.msk.bf16.vlgmr.msra.gmra.mrb[60].mxu1 %vm751_vm0, %v5801_v5 }
 0xa74   : > { %4855 = vmatpush3.bf16.msra.mxu0 %v5101_v12  ;;  %4879 = vmatpush3.bf16.msra.mxu1 %v5102_v13 }
 0xa75   : > { %4856 = vmatprep.subr.bf16.mxu0 %v5235_v9  ;;  %4880 = vmatprep.subr.bf16.mxu1 %v5235_v9 }
 0xa76   : > { %4858 = vmatprep.mubr.msk.bf16.mxu0 %vm5236_vm1, %v5235_v9  ;;  %4882 = vmatprep.mubr.msk.bf16.mxu1 %vm5236_vm1, %v5235_v9 }
 0xa78   : > { %4857 = vmatpush3.bf16.msra.mxu0 %v5103_v14  ;;  %4881 = vmatpush3.bf16.msra.mxu1 %v5104_v15  ;;  %v4338_v15 = vld [vmem:[%s6249_s2 + $0x5] ss:$0 sm:$0xff] }
 0xa79   : > { %4870 = vmatprep.subr.bf16.mxu0 %v5235_v9  ;;  %4894 = vmatprep.subr.bf16.mxu1 %v5235_v9 }
 0xa7b   : > { %4859 = vmatmul.mubr.msk.bf16.vlgmr.msra.gmra.mrb[64].mxu0 %vm751_vm0, %v5801_v5  ;;  %4883 = vmatmul.mubr.msk.bf16.vlgmr.msra.gmra.mrb[64].mxu1 %vm751_vm0, %v5801_v5 }
 0xa7c   : > { %4871 = vmatpush3.bf16.msra.mxu0 %v5105_v16  ;;  %4895 = vmatpush3.bf16.msra.mxu1 %v5106_v17 }
 0xa7d   : > { %4872 = vmatprep.subr.bf16.mxu0 %v5235_v9  ;;  %4896 = vmatprep.subr.bf16.mxu1 %v5235_v9 }
 0xa7e   : > { %4874 = vmatprep.mubr.msk.bf16.mxu0 %vm5236_vm1, %v5235_v9  ;;  %4898 = vmatprep.mubr.msk.bf16.mxu1 %vm5236_vm1, %v5235_v9 }
 0xa80   : > { %4873 = vmatpush3.bf16.msra.mxu0 %v5107_v18  ;;  %4897 = vmatpush3.bf16.msra.mxu1 %v5108_v19  ;;  %v4376_v18 = vld [vmem:[%s6248_s1 + $0x7] ss:$0 sm:$0xff]  ;;  %s6252_s1 = sld [smem:[#allocation21_spill]] }
 0xa81   : > { %4886 = vmatprep.subr.bf16.mxu0 %v5235_v9  ;;  %4910 = vmatprep.subr.bf16.mxu1 %v5235_v9 }
 0xa83   : > { %4875 = vmatmul.mubr.msk.bf16.vlgmr.msra.gmra.mrb[68].mxu0 %vm751_vm0, %v5801_v5  ;;  %4899 = vmatmul.mubr.msk.bf16.vlgmr.msra.gmra.mrb[68].mxu1 %vm751_vm0, %v5801_v5 }
 0xa84   : > { %4887 = vmatpush3.bf16.msra.mxu0 %v5109_v21  ;;  %4890 = vmatprep.mubr.msk.bf16.mxu0 %vm5236_vm1, %v5235_v9 }
 0xa85   : > { %4888 = vmatprep.subr.bf16.mxu0 %v5235_v9  ;;  %4912 = vmatprep.mubr.msk.bf16.mxu1 %vm5236_vm1, %v5235_v9 }
 0xa88   : > { %4889 = vmatpush3.bf16.msra.mxu0 %v5110_v22 }
 0xa89   : > { %4902 = vmatprep.subr.bf16.mxu0 %v5235_v9 }
 0xa8b   : > { %4891 = vmatmul.mubr.msk.bf16.vlgmr.msra.gmra.mrb[72].mxu0 %vm751_vm0, %v5801_v5 }
 0xa8c   : > { %4903 = vmatpush3.bf16.msra.mxu0 %v5111_v23  ;;  %4906 = vmatprep.mubr.msk.bf16.mxu0 %vm5236_vm1, %v5235_v9 }
 0xa8d   : > { %4904 = vmatprep.subr.bf16.mxu0 %v5235_v9 }
 0xa90   : > { %4905 = vmatpush3.bf16.msra.mxu0 %v5112_v24 }
 0xa91   : > { %4916 = vmatprep.subr.bf16.mxu0 %v5235_v9 }
 0xa93   : > { %4907 = vmatmul.mubr.msk.bf16.vlgmr.msra.gmra.mrb[76].mxu0 %vm751_vm0, %v5801_v5 }
 0xa94   : > { %4918 = vmatprep.mubr.msk.bf16.mxu0 %vm5236_vm1, %v5235_v9 }
 0xb36   : > { %v2499_v25 = vpop.f32.mrb[52].mxu0  ;;  %v2603_v26 = vpop.f32.mrb[52].mxu1 }
 0xb37   : > { %v4820_v27 = vpop.f32.mrb[53].mxu0  ;;  %v4836_v28 = vpop.f32.mrb[53].mxu1  ;;  %v2500_v47 = vadd.f32 %v4337_v44, %v2499_v25  ;;  %v2604_v56 = vadd.f32 %v4339_v61, %v2603_v26 }
 0xb38   : > { %v2502_v29 = vpop.f32.mrb[54].mxu0  ;;  %v2606_v30 = vpop.f32.mrb[54].mxu1 }
 0xb39   : > { %v4821_v31 = vpop.f32.mrb[55].mxu0  ;;  %v4837_v32 = vpop.f32.mrb[55].mxu1  ;;  %v3169_v55 = vpack.c.bf16 %v2500_v47, %v2500_v47  ;;  %v3171_v10 = vpack.c.bf16 %v2604_v56, %v2604_v56 }
 0xb3a   : > { %v4340_v32 = vld [vmem:[%s6249_s2 + $0x7] ss:$0 sm:$0xff]  ;;  %s6138_s2 = scalar_lea.hbm %s6252_s1, %s4481_s24 }
 0xb3e   : > { %v2551_v34 = vpop.f32.mrb[56].mxu0  ;;  %v2753_v35 = vpop.f32.mrb[56].mxu1 }
 0xb3f   : > { %v2754_v36 = vadd.f32 %v4373_v33, %v2753_v35  ;;  %v4828_v37 = vpop.f32.mrb[57].mxu0  ;;  %v4852_v38 = vpop.f32.mrb[57].mxu1  ;;  %v2552_v19 = vadd.f32 %v4338_v15, %v2551_v34  ;;  %v4410_v34 = vld [vmem:[%s6189_s9 + $0x5] ss:$0 sm:$0xff] }
 0xb40   : > { %v2554_v39 = vpop.f32.mrb[58].mxu0  ;;  %v2756_v40 = vpop.f32.mrb[58].mxu1 }
 0xb41   : > { %v3173_v41 = vpack.c.bf16 %v2754_v36, %v2754_v36  ;;  %v4829_v42 = vpop.f32.mrb[59].mxu0  ;;  %v4853_v43 = vpop.f32.mrb[59].mxu1  ;;  %v3170_v28 = vpack.c.bf16 %v2552_v19, %v2552_v19 }
 0xb43   : > { %v3181_v45 = vsel %vm1554_vm2, %v3173_v41, 0 }
 0xb44   : > { %4911 = vmatpush3.bf16.xpose.msra.mxu1 %v3181_v45 }
 0xb45   : > { %4922 = vmatprep.subr.bf16.mxu1 %v5235_v9 }
 0xb46   : > { %v2655_v48 = vpop.f32.mrb[60].mxu0  ;;  %v2857_v49 = vpop.f32.mrb[60].mxu1 }
 0xb47   : > { %v2858_v50 = vadd.f32 %v4375_v46, %v2857_v49  ;;  %v4844_v51 = vpop.f32.mrb[61].mxu0  ;;  %v4868_v52 = vpop.f32.mrb[61].mxu1  ;;  %v2656_v35 = vadd.f32 %v4340_v32, %v2655_v48  ;;  %v4411_v32 = vld [vmem:[%s6189_s9 + $0x6] ss:$0 sm:$0xff] }
 0xb48   : > { %v2658_v53 = vpop.f32.mrb[62].mxu0  ;;  %v2860_v54 = vpop.f32.mrb[62].mxu1 }
 0xb49   : > { %v3175_v58 = vpack.c.bf16 %v2858_v50, %v2858_v50  ;;  %v4845_v59 = vpop.f32.mrb[63].mxu0  ;;  %v4869_v60 = vpop.f32.mrb[63].mxu1  ;;  %v3172_v40 = vpack.c.bf16 %v2656_v35, %v2656_v35 }
 0xb4b   : > { %v3273_v62 = vsel %vm1554_vm2, %v3175_v58, 0  ;;  %4913 = vmatmul.mubr.msk.bf16.vlgmr.msra.gmra.mrb[72].mxu1 %vm1554_vm2, %v3169_v55 }
 0xb4c   : > { %4923 = vmatpush3.bf16.xpose.msra.mxu1 %v3273_v62  ;;  %4924 = vmatprep.mubr.msk.bf16.mxu1 %vm5236_vm1, %v5235_v9 }
 0xb4d   : > { %4934 = vmatprep.subr.bf16.mxu1 %v5235_v9 }
 0xb4e   : > { %v2805_v2 = vpop.f32.mrb[64].mxu0  ;;  %v3007_v57 = vpop.f32.mrb[64].mxu1 }
 0xb4f   : > { %v2806_v4 = vadd.f32 %v4374_v63, %v2805_v2  ;;  %v3008_v5 = vadd.f32 %v4409_v1, %v3007_v57  ;;  %v4860_v6 = vpop.f32.mrb[65].mxu0  ;;  %v4884_v7 = vpop.f32.mrb[65].mxu1 }
 0xb50   : > { %v2808_v8 = vpop.f32.mrb[66].mxu0  ;;  %v3010_v20 = vpop.f32.mrb[66].mxu1 }
 0xb51   : > { %v3174_v11 = vpack.c.bf16 %v2806_v4, %v2806_v4  ;;  %v3409_v12 = vpack.c.bf16 %v3008_v5, %v3008_v5  ;;  %v4861_v13 = vpop.f32.mrb[67].mxu0  ;;  %v4885_v14 = vpop.f32.mrb[67].mxu1 }
 0xb53   : > { %v3227_v16 = vsel %vm1554_vm2, %v3174_v11, 0  ;;  %v3417_v17 = vsel %vm1794_vm3, %v3409_v12, 0  ;;  %4925 = vmatmul.mubr.msk.bf16.vlgmr.msra.gmra.mrb[76].mxu1 %vm1554_vm2, %v3171_v10 }
 0xb54   : > { %4917 = vmatpush3.bf16.xpose.msra.mxu0 %v3227_v16  ;;  %4935 = vmatpush3.bf16.msra.mxu1 %v3417_v17 }
 0xb55   : > { %4928 = vmatprep.subr.bf16.mxu0 %v5235_v9  ;;  %4936 = vmatprep.mubr.msk.bf16.mxu1 %vm5236_vm1, %v5235_v9 }
 0xb56   : > { %v2909_v21 = vpop.f32.mrb[68].mxu0  ;;  %v5962_v22 = vpop.f32.mrb[68].mxu1  ;;  %4946 = vmatprep.subr.bf16.mxu1 %v5235_v9 }
 0xb57   : > { %v2910_v23 = vadd.f32 %v4376_v18, %v2909_v21  ;;  %v4876_v24 = vpop.f32.mrb[69].mxu0  ;;  %v4900_v25 = vpop.f32.mrb[69].mxu1 }
 0xb58   : > { %v2912_v26 = vpop.f32.mrb[70].mxu0  ;;  %v3114_v27 = vpop.f32.mrb[70].mxu1 }
 0xb59   : > { %v3176_v29 = vpack.c.bf16 %v2910_v23, %v2910_v23  ;;  %v4877_v30 = vpop.f32.mrb[71].mxu0  ;;  %v4901_v31 = vpop.f32.mrb[71].mxu1 }
 0xb5b   : > { %v3319_v33 = vsel %vm1554_vm2, %v3176_v29, 0  ;;  %4919 = vmatmul.mubr.msk.bf16.vlgmr.msra.gmra.mrb[80].mxu0 %vm1554_vm2, %v3170_v28 }
 0xb5c   : > { %4929 = vmatpush3.bf16.xpose.msra.mxu0 %v3319_v33  ;;  %4930 = vmatprep.mubr.msk.bf16.mxu0 %vm5236_vm1, %v5235_v9  ;;  %v3112_v33 = vadd.f32 %v4411_v32, %v5962_v22 }
 0xb5d   : > { %4940 = vmatprep.subr.bf16.mxu0 %v5235_v9 }
 0xb5e   : > { %v3059_v36 = vpop.f32.mrb[72].mxu0 }
 0xb5f   : > { %v3060_v37 = vadd.f32 %v4410_v34, %v3059_v36  ;;  %v4892_v38 = vpop.f32.mrb[73].mxu0  ;;  %v3411_v36 = vpack.c.bf16 %v3112_v33, %v3112_v33 }
 0xb60   : > { %v3062_v39 = vpop.f32.mrb[74].mxu0 }
 0xb61   : > { %v3410_v41 = vpack.c.bf16 %v3060_v37, %v3060_v37  ;;  %v4893_v42 = vpop.f32.mrb[75].mxu0  ;;  %v3509_v39 = vsel %vm1794_vm3, %v3411_v36, 0 }
 0xb62   : > { %v4412_v42 = vld [vmem:[%s6189_s9 + $0x7] ss:$0 sm:$0xff] }
 0xb63   : > { %v3463_v43 = vsel %vm1794_vm3, %v3410_v41, 0  ;;  %4931 = vmatmul.mubr.msk.bf16.vlgmr.msra.gmra.mrb[84].mxu0 %vm1554_vm2, %v3172_v40 }
 0xb64   : > { %4941 = vmatpush3.bf16.msra.mxu0 %v3463_v43  ;;  %4942 = vmatprep.mubr.msk.bf16.mxu0 %vm5236_vm1, %v5235_v9 }
 0xb65   : > { %4952 = vmatprep.subr.bf16.mxu0 %v5235_v9 }
 0xb66   : > { %v5981_v44 = vpop.f32.mrb[76].mxu0 }
 0xb67   : > { %v4908_v45 = vpop.f32.mrb[77].mxu0 }
 0xb68   : > { %v3166_v46 = vpop.f32.mrb[78].mxu0  ;;  %v3164_v45 = vadd.f32 %v4412_v42, %v5981_v44 }
 0xb69   : > { %v4909_v47 = vpop.f32.mrb[79].mxu0 }
 0xc1e   : > { %v3217_v48 = vpop.f32.mrb[72].mxu1 }
 0xc1f   : > { %v3218_v49 = vadd.f32 %v5645_v0, %v3217_v48  ;;  %v4914_v50 = vpop.f32.mrb[73].mxu1  ;;  %v3412_v48 = vpack.c.bf16 %v3164_v45, %v3164_v45 }
 0xc20   : > { %v3220_v51 = vpop.f32.mrb[74].mxu1 }
 0xc21   : > { %v4915_v52 = vpop.f32.mrb[75].mxu1  ;;  %v3361_v53 = vsel %vm1554_vm2, %v3218_v49, -inf  ;;  %v3555_v51 = vsel %vm1794_vm3, %v3412_v48, 0 }
 0xc22   : > { %3362 = vmax.xlane.f32.xlu0 %v3361_v53 }
 0xc26   : > { %v3309_v54 = vpop.f32.mrb[76].mxu1 }
 0xc27   : > { %v3310_v55 = vadd.f32 %v5645_v0, %v3309_v54  ;;  %v4926_v58 = vpop.f32.mrb[77].mxu1  ;;  %v4433_v54 = vld [vmem:[%s6190_s10 + $0x10] sm:$0xf] }
 0xc28   : > { %v3312_v59 = vpop.f32.mrb[78].mxu1  ;;  %v4434_v58 = vld [vmem:[%s6190_s10 + $0x14] sm:$0xf] }
 0xc29   : > { %v4927_v60 = vpop.f32.mrb[79].mxu1  ;;  %v3367_v61 = vsel %vm1554_vm2, %v3310_v55, -inf  ;;  %v3656_v59 = vsel %vm1794_vm3, %v4434_v58, 0 }
 0xc2a   : > { %3368 = vmax.xlane.f32.xlu0 %v3367_v61  ;;  %v4435_v60 = vld [vmem:[%s6190_s10 + $0x18] sm:$0xf] }
 0xc2e   : > { %v3263_v62 = vpop.f32.mrb[80].mxu0 }
 0xc2f   : > { %v3264_v63 = vadd.f32 %v5645_v0, %v3263_v62  ;;  %v4920_v1 = vpop.f32.mrb[81].mxu0 }
 0xc30   : > { %v3266_v56 = vpop.f32.mrb[82].mxu0  ;;  %v3702_v1 = vsel %vm1794_vm3, %v4435_v60, 0 }
 0xc31   : > { %v4921_v2 = vpop.f32.mrb[83].mxu0  ;;  %v3364_v57 = vsel %vm1554_vm2, %v3264_v63, -inf }
 0xc32   : > { %3365 = vmax.xlane.f32.xlu1 %v3364_v57 }
 0xc36   : > { %v3355_v4 = vpop.f32.mrb[84].mxu0 }
 0xc37   : > { %v3356_v5 = vadd.f32 %v5645_v0, %v3355_v4  ;;  %v4932_v6 = vpop.f32.mrb[85].mxu0 }
 0xc38   : > { %v3358_v7 = vpop.f32.mrb[86].mxu0 }
 0xc39   : > { %v4933_v8 = vpop.f32.mrb[87].mxu0  ;;  %v3370_v20 = vsel %vm1554_vm2, %v3356_v5, -inf }
 0xc3a   : > { %3371 = vmax.xlane.f32.xlu1 %v3370_v20  ;;  %v4436_v8 = vld [vmem:[%s6190_s10 + $0x1c] sm:$0xf] }
 0xcaf   : > { %v3363_v10 = vpop.xlane.xlu0 %3362 }
 0xcb0   : > { %v3373_v11 = vsub.f32 %v3218_v49, %v3363_v10 }
 0xcb2   : > { %v3377_v12 = vmul.f32 1.442695, %v3373_v11 }
 0xcb4   : > { %5147 = vpow2.f32 %v3377_v12  ;;  %v3748_v12 = vsel %vm1794_vm3, %v4436_v8, 0 }
 0xcb7   : > { %v3369_v13 = vpop.xlane.xlu0 %3368 }
 0xcb8   : > { %v3375_v14 = vsub.f32 %v3310_v55, %v3369_v13  ;;  %v3610_v55 = vsel %vm1794_vm3, %v4433_v54, 0 }
 0xcba   : > { %v3381_v15 = vmul.f32 1.442695, %v3375_v14 }
 0xcbc   : > { %5149 = vpow2.f32 %v3381_v15 }
 0xcbe   : > { %v5148_v16 = vpop.eup %5147 }
 0xcbf   : > { %v3366_v17 = vpop.xlane.xlu1 %3365  ;;  %v3385_v18 = vsel %vm1554_vm2, %v5148_v16, 0.0 }
 0xcc0   : > { %v3374_v19 = vsub.f32 %v3264_v63, %v3366_v17  ;;  %3386 = vadd.xlane.f32.xlu0 %v3385_v18 }
 0xcc2   : > { %v3379_v0 = vmul.f32 1.442695, %v3374_v19 }
 0xcc4   : > { %5151 = vpow2.f32 %v3379_v0 }
 0xcc6   : > { %v5150_v21 = vpop.eup %5149 }
 0xcc7   : > { %v3372_v23 = vpop.xlane.xlu1 %3371  ;;  %v3391_v24 = vsel %vm1554_vm2, %v5150_v21, 0.0 }
 0xcc8   : > { %v3376_v25 = vsub.f32 %v3356_v5, %v3372_v23  ;;  %3392 = vadd.xlane.f32.xlu0 %v3391_v24 }
 0xcca   : > { %v3383_v26 = vmul.f32 1.442695, %v3376_v25 }
 0xccc   : > { %5153 = vpow2.f32 %v3383_v26 }
 0xcce   : > { %v5152_v27 = vpop.eup %5151 }
 0xccf   : > { %v3388_v28 = vsel %vm1554_vm2, %v5152_v27, 0.0 }
 0xcd0   : > { %3389 = vadd.xlane.f32.xlu1 %v3388_v28 }
 0xcd6   : > { %v5154_v29 = vpop.eup %5153 }
 0xcd7   : > { %v3394_v30 = vsel %vm1554_vm2, %v5154_v29, 0.0 }
 0xcd8   : > { %3395 = vadd.xlane.f32.xlu1 %v3394_v30 }
 0xd4d   : > { %v3387_v31 = vpop.xlane.xlu0 %3386 }
 0xd4e   : > { %5155 = vrcp.f32 %v3387_v31 }
 0xd55   : > { %v3393_v34 = vpop.xlane.xlu0 %3392 }
 0xd56   : > { %5157 = vrcp.f32 %v3393_v34 }
 0xd58   : > { %v5156_v35 = vpop.eup %5155 }
 0xd59   : > { %v3401_v37 = vmul.f32 %v5156_v35, %v5148_v16 }
 0xd5b   : > { %v3405_v38 = vpack.c.bf16 %v3401_v37, %v3401_v37 }
 0xd5d   : > { %4937 = vmatmul.mubr.msk.bf16.vlgmr.msra.gmra.mrb[80].mxu1 %vm1554_vm2, %v3405_v38  ;;  %v3390_v40 = vpop.xlane.xlu1 %3389 }
 0xd5e   : > { %4947 = vmatpush3.bf16.msra.mxu1 %v3509_v39  ;;  %5159 = vrcp.f32 %v3390_v40  ;;  %4948 = vmatprep.mubr.msk.bf16.mxu1 %vm5236_vm1, %v5235_v9  ;;  %v4442_v40 = vld [vmem:[%s6191_s11 + $0x1] ss:$0 sm:$0xff] }
 0xd5f   : > { %4958 = vmatprep.subr.bf16.mxu1 %v5235_v9 }
 0xd60   : > { %v5158_v41 = vpop.eup %5157 }
 0xd61   : > { %v3403_v22 = vmul.f32 %v5158_v41, %v5150_v21 }
 0xd63   : > { %v3407_v43 = vpack.c.bf16 %v3403_v22, %v3403_v22 }
 0xd65   : > { %4949 = vmatmul.mubr.msk.bf16.vlgmr.msra.gmra.mrb[84].mxu1 %vm1554_vm2, %v3407_v43  ;;  %v3396_v46 = vpop.xlane.xlu1 %3395 }
 0xd66   : > { %5161 = vrcp.f32 %v3396_v46  ;;  %4960 = vmatprep.mubr.msk.bf16.mxu1 %vm5236_vm1, %v5235_v9  ;;  %4959 = vmatpush3.bf16.msra.mxu1 %v3610_v55 }
 0xd67   : > { %4970 = vmatprep.subr.bf16.mxu1 %v5235_v9 }
 0xd68   : > { %v5160_v47 = vpop.eup %5159 }
 0xd69   : > { %v3402_v49 = vmul.f32 %v5160_v47, %v5152_v27 }
 0xd6b   : > { %v3406_v50 = vpack.c.bf16 %v3402_v49, %v3402_v49 }
 0xd6d   : > { %4943 = vmatmul.mubr.msk.bf16.vlgmr.msra.gmra.mrb[88].mxu0 %vm1554_vm2, %v3406_v50 }
 0xd6e   : > { %4953 = vmatpush3.bf16.msra.mxu0 %v3555_v51  ;;  %4954 = vmatprep.mubr.msk.bf16.mxu0 %vm5236_vm1, %v5235_v9 }
 0xd6f   : > { %4964 = vmatprep.subr.bf16.mxu0 %v5235_v9 }
 0xd70   : > { %v5162_v44 = vpop.eup %5161 }
 0xd71   : > { %v3404_v52 = vmul.f32 %v5162_v44, %v5154_v29 }
 0xd73   : > { %v3408_v53 = vpack.c.bf16 %v3404_v52, %v3404_v52  ;;  %v5113_v52 = vld [vmem:[%s6194_s14 + $0x10] sm:$0xff]  }
 0xd75   : > { %4955 = vmatmul.mubr.msk.bf16.vlgmr.msra.gmra.mrb[92].mxu0 %vm1554_vm2, %v3408_v53  ;;  %v5114_v53 = vld [vmem:[%s6194_s14 + $0x18] sm:$0xff]  }
 0xd76   : > { %4966 = vmatprep.mubr.msk.bf16.mxu0 %vm5236_vm1, %v5235_v9  ;;  %4965 = vmatpush3.bf16.msra.mxu0 %v3656_v59  ;;  %v4445_v59 = vld [vmem:[%s6192_s12 + $0x1] ss:$0 sm:$0xff] }
 0xd77   : > { %4976 = vmatprep.subr.bf16.mxu0 %v5235_v9 }
 0xe30   : > { %v3453_v61 = vpop.f32.mrb[80].mxu1 }
 0xe31   : > { %v3597_v62 = vpack.c.bf16 %v3453_v61, %v3453_v61  ;;  %v4938_v63 = vpop.f32.mrb[81].mxu1  ;;  %v4446_v61 = vld [vmem:[%s6193_s13 + $0x1] ss:$0 sm:$0xff] }
 0xe32   : > { %v3456_v56 = vpop.f32.mrb[82].mxu1 }
 0xe33   : > { %v4939_v2 = vpop.f32.mrb[83].mxu1  ;;  %4961 = vmatmul.mubr.msk.bf16.vlgmr.msra.gmra.mrb[88].mxu1 %vm1554_vm2, %v3597_v62  ;;  %v5115_v56 = vld [vmem:[%s6196_s16 + $0x20] sm:$0xff]  }
 0xe34   : > { %4971 = vmatpush3.bf16.msra.mxu1 %v3702_v1  ;;  %4972 = vmatprep.mubr.msk.bf16.mxu1 %vm5236_vm1, %v5235_v9  ;;  %v5116_v2 = vld [vmem:[%s6196_s16 + $0x28] sm:$0xff]  }
 0xe35   : > { %4982 = vmatprep.subr.bf16.mxu1 %v5235_v9 }
 0xe38   : > { %v3545_v57 = vpop.f32.mrb[84].mxu1 }
 0xe39   : > { %v3599_v4 = vpack.c.bf16 %v3545_v57, %v3545_v57  ;;  %v4950_v5 = vpop.f32.mrb[85].mxu1  ;;  %v5117_v57 = vld [vmem:[%s6196_s16 + $0x30] sm:$0xff]  }
 0xe3a   : > { %v3548_v6 = vpop.f32.mrb[86].mxu1  ;;  %v4452_v5 = vld [vmem:[%s6195_s15 + $0x1] ss:$0 sm:$0xff] }
 0xe3b   : > { %v4951_v7 = vpop.f32.mrb[87].mxu1  ;;  %4973 = vmatmul.mubr.msk.bf16.vlgmr.msra.gmra.mrb[92].mxu1 %vm1554_vm2, %v3599_v4  ;;  %v5118_v4 = vld [vmem:[%s6196_s16 + $0x38] sm:$0xff]  }
 0xe3c   : > { %4986 = vmatprep.mubr.msk.bf16.mxu1 %vm5236_vm1, %v5235_v9  ;;  %4983 = vmatpush3.bf16.msra.mxu1 %v5113_v52 }
 0xe3d   : > { %4984 = vmatprep.subr.bf16.mxu1 %v5235_v9 }
 0xe40   : > { %v3499_v20 = vpop.f32.mrb[88].mxu0  ;;  %4985 = vmatpush3.bf16.msra.mxu1 %v5114_v53 }
 0xe41   : > { %v3598_v10 = vpack.c.bf16 %v3499_v20, %v3499_v20  ;;  %v4944_v11 = vpop.f32.mrb[89].mxu0  ;;  %5002 = vmatprep.subr.bf16.mxu1 %v5235_v9 }
 0xe42   : > { %v3502_v13 = vpop.f32.mrb[90].mxu0 }
 0xe43   : > { %v4945_v14 = vpop.f32.mrb[91].mxu0  ;;  %4967 = vmatmul.mubr.msk.bf16.vlgmr.msra.gmra.mrb[96].mxu0 %vm1554_vm2, %v3598_v10 }
 0xe44   : > { %4977 = vmatpush3.bf16.msra.mxu0 %v3748_v12  ;;  %4978 = vmatprep.mubr.msk.bf16.mxu0 %vm5236_vm1, %v5235_v9 }
 0xe45   : > { %4990 = vmatprep.subr.bf16.mxu0 %v5235_v9 }
 0xe48   : > { %v3591_v15 = vpop.f32.mrb[92].mxu0 }
 0xe49   : > { %v3600_v16 = vpack.c.bf16 %v3591_v15, %v3591_v15  ;;  %v4956_v17 = vpop.f32.mrb[93].mxu0 }
 0xe4a   : > { %v3594_v18 = vpop.f32.mrb[94].mxu0 }
 0xe4b   : > { %v4957_v19 = vpop.f32.mrb[95].mxu0  ;;  %4979 = vmatmul.mubr.msk.bf16.vlgmr.msra.gmra.mrb[100].mxu0 %vm1554_vm2, %v3600_v16 }
 0xe4c   : > { %4998 = vmatprep.mubr.msk.bf16.mxu0 %vm5236_vm1, %v5235_v9  ;;  %4991 = vmatpush3.bf16.msra.mxu0 %v5115_v56 }
 0xe4d   : > { %4992 = vmatprep.subr.bf16.mxu0 %v5235_v9 }
 0xe50   : > { %4993 = vmatpush3.bf16.msra.mxu0 %v5116_v2 }
 0xe51   : > { %4994 = vmatprep.subr.bf16.mxu0 %v5235_v9 }
 0xe54   : > { %4995 = vmatpush3.bf16.msra.mxu0 %v5117_v57 }
 0xe55   : > { %4996 = vmatprep.subr.bf16.mxu0 %v5235_v9 }
 0xe58   : > { %4997 = vmatpush3.bf16.msra.mxu0 %v5118_v4 }
 0xf06   : > { %v3646_v0 = vpop.f32.mrb[88].mxu1 }
 0xf07   : > { %v4962_v21 = vpop.f32.mrb[89].mxu1  ;;  %v3790_v30 = vsel %vm751_vm0, %v3646_v0, 0.0 }
 0xf08   : > { %v3649_v23 = vpop.f32.mrb[90].mxu1  ;;  %v4465_v21 = vld [vmem:[%s6197_s17 + $0x1] ss:$0 sm:$0xff] }
 0xf09   : > { %v4963_v24 = vpop.f32.mrb[91].mxu1 }
 0xf0e   : > { %v3738_v25 = vpop.f32.mrb[92].mxu1 }
 0xf0f   : > { %v4974_v26 = vpop.f32.mrb[93].mxu1  ;;  %v3793_v35 = vsel %vm751_vm0, %v3738_v25, 0.0 }
 0xf10   : > { %v3741_v27 = vpop.f32.mrb[94].mxu1 }
 0xf11   : > { %v4975_v28 = vpop.f32.mrb[95].mxu1 }
 0xf16   : > { %v3692_v29 = vpop.f32.mrb[96].mxu0 }
 0xf17   : > { %v3791_v31 = vsel %vm751_vm0, %v3692_v29, 0.0  ;;  %v4968_v32 = vpop.f32.mrb[97].mxu0 }
 0xf18   : > { %v3792_v33 = vadd.f32 %v3791_v31, %v3790_v30  ;;  %v3695_v34 = vpop.f32.mrb[98].mxu0 }
 0xf19   : > { %v4969_v36 = vpop.f32.mrb[99].mxu0 }
 0xf1a   : > { %v3794_v37 = vadd.f32 %v3793_v35, %v3792_v33  ;;  %v5119_v35 = vld [vmem:[%s6200_s20] sm:$0xff]   ;;  %v5120_v36 = vld [vmem:[%s6200_s20 + $0x8] sm:$0xff]  }
 0xf1e   : > { %v3784_v38 = vpop.f32.mrb[100].mxu0 }
 0xf1f   : > { %v3795_v39 = vsel %vm751_vm0, %v3784_v38, 0.0  ;;  %v4980_v41 = vpop.f32.mrb[101].mxu0 }
 0xf20   : > { %v3796_v22 = vadd.f32 %v3795_v39, %v3794_v37  ;;  %v3787_v42 = vpop.f32.mrb[102].mxu0  ;;  %v4473_v41 = vld [vmem:[%s6198_s18 + $0x1] ss:$0 sm:$0xff] }
 0xf21   : > { %v4981_v43 = vpop.f32.mrb[103].mxu0  ;;  %v4474_v42 = vld [vmem:[%s6199_s19 + $0x1] ss:$0 sm:$0xff] }
 0xf22   : > { %v3805_v45 = vadd.f32 %v4442_v40, %v3796_v22 }
 0xf24   : > { %v3806_v46 = vadd.f32 %v3805_v45, %v5791_v3 }
 0xf26   : > { %v3811_v47 = vsel %vm751_vm0, %v3806_v46, 0.0 }
 0xf27   : > { %3812 = vadd.xlane.f32.xlu0 %v3811_v47  ;;  %v5121_v47 = vld [vmem:[%s6202_s22] sm:$0xff]  }
 0xfb4   : > { %v3813_v48 = vpop.xlane.xlu0 %3812 }
 0xfb5   : > { %v3814_v49 = vmul.f32 0.03125, %v3813_v48  ;;  %v5122_v48 = vld [vmem:[%s6202_s22 + $0x8] sm:$0xff]  }
 0xfb7   : > { %v3815_v50 = vsub.f32 %v3806_v46, %v3814_v49  ;;  %v4038_v49 = vld [vmem:[%s6201_s21] sm:$0x1] }
 0xfb9   : > { %v3816_v51 = vmul.f32 %v3815_v50, %v3815_v50 }
 0xfbb   : > { %v3817_v44 = vsel %vm751_vm0, %v3816_v51, 0.0 }
 0xfbc   : > { %3818 = vadd.xlane.f32.xlu1 %v3817_v44 }
0x1049   : > { %v3819_v3 = vpop.xlane.xlu1 %3818 }
0x104a   : > { %v3820_v54 = vmul.f32 0.03125, %v3819_v3 }
0x104c   : > { %v3821_v55 = vadd.f32 1e-12, %v3820_v54 }
0x104e   : > { %5163 = vrsqrt.f32 %v3821_v55 }
0x1058   : > { %v5164_v58 = vpop.eup %5163 }
0x1059   : > { %v3823_v60 = vmul.f32 %v5164_v58, %v3815_v50 }
0x105b   : > { %v3830_v62 = vmul.f32 %v4445_v59, %v3823_v60 }
0x105d   : > { %v3837_v63 = vadd.f32 %v4446_v61, %v3830_v62 }
0x105f   : > { %v3838_v1 = vpack.c.bf16 %v3837_v63, %v3837_v63 }
0x1061   : > { %4987 = vmatmul.mubr.msk.bf16.vlgmr.msra.gmra.mrb[96].mxu1 %vm751_vm0, %v3838_v1 }
0x1062   : > { %5006 = vmatprep.mubr.msk.bf16.mxu1 %vm5236_vm1, %v5235_v9  ;;  %5003 = vmatpush3.bf16.msra.mxu1 %v5119_v35 }
0x1063   : > { %5004 = vmatprep.subr.bf16.mxu1 %v5235_v9 }
0x1066   : > { %5005 = vmatpush3.bf16.msra.mxu1 %v5120_v36 }
0x1067   : > { %5010 = vmatprep.subr.bf16.mxu1 %v5235_v9 }
0x1134   : > { %v3901_v6 = vpop.f32.mrb[96].mxu1 }
0x1135   : > { %v3902_v7 = vadd.f32 %v4452_v5, %v3901_v6  ;;  %v4988_v8 = vpop.f32.mrb[97].mxu1 }
0x1136   : > { %v3904_v20 = vpop.f32.mrb[98].mxu1 }
0x1137   : > { %v3908_v10 = vmul.f32 0.044715, %v3902_v7  ;;  %v4989_v11 = vpop.f32.mrb[99].mxu1  ;;  %v3907_v17 = vmul.f32 0.5, %v3902_v7 }
0x1139   : > { %v3909_v12 = vmul.f32 %v3908_v10, %v3902_v7 }
0x113b   : > { %v3910_v13 = vmul.f32 %v3909_v12, %v3902_v7 }
0x113d   : > { %v3911_v14 = vadd.f32 %v3910_v13, %v3902_v7 }
0x113f   : > { %v3912_v15 = vmul.f32 0.7978846, %v3911_v14 }
0x1141   : > { %5165 = vtanh.f32 %v3912_v15 }
0x114b   : > { %v5166_v16 = vpop.eup %5165 }
0x114c   : > { %v3914_v18 = vadd.f32 1.0, %v5166_v16 }
0x114e   : > { %v3915_v19 = vmul.f32 %v3914_v18, %v3907_v17 }
0x1150   : > { %v3916_v0 = vpack.c.bf16 %v3915_v19, %v3915_v19 }
0x1152   : > { %4999 = vmatmul.mubr.msk.bf16.vlgmr.msra.gmra.mrb[104].mxu0 %vm2329_vm4, %v3916_v0 }
0x1225   : > { %v3995_v23 = vpop.f32.mrb[104].mxu0 }
0x1226   : > { %v3996_v24 = vadd.f32 %v4465_v21, %v3995_v23  ;;  %v5000_v25 = vpop.f32.mrb[105].mxu0 }
0x1227   : > { %v3998_v26 = vpop.f32.mrb[106].mxu0 }
0x1228   : > { %v5001_v27 = vpop.f32.mrb[107].mxu0  ;;  %v4001_v28 = vadd.f32 %v3996_v24, %v3837_v63 }
0x122a   : > { %v4006_v29 = vsel %vm751_vm0, %v4001_v28, 0.0 }
0x122b   : > { %4007 = vadd.xlane.f32.xlu0 %v4006_v29 }
0x12b8   : > { %v4008_v30 = vpop.xlane.xlu0 %4007 }
0x12b9   : > { %v4009_v31 = vmul.f32 0.03125, %v4008_v30 }
0x12bb   : > { %v4010_v32 = vsub.f32 %v4001_v28, %v4009_v31 }
0x12bd   : > { %v4011_v33 = vmul.f32 %v4010_v32, %v4010_v32 }
0x12bf   : > { %v4012_v34 = vsel %vm751_vm0, %v4011_v33, 0.0 }
0x12c0   : > { %4013 = vadd.xlane.f32.xlu1 %v4012_v34 }
0x134d   : > { %v4014_v37 = vpop.xlane.xlu1 %4013 }
0x134e   : > { %v4015_v38 = vmul.f32 0.03125, %v4014_v37 }
0x1350   : > { %v4016_v39 = vadd.f32 1e-12, %v4015_v38 }
0x1352   : > { %5167 = vrsqrt.f32 %v4016_v39 }
0x135c   : > { %v5168_v40 = vpop.eup %5167 }
0x135d   : > { %v4018_v22 = vmul.f32 %v5168_v40, %v4010_v32 }
0x135f   : > { %v4025_v43 = vmul.f32 %v4473_v41, %v4018_v22 }
0x1361   : > { %v4032_v45 = vadd.f32 %v4474_v42, %v4025_v43 }
0x1363   : > { %v4033_v46 = vpack.c.bf16 %v4032_v45, %v4032_v45 }
0x1365   : > { %5007 = vmatmul.mubr.msk.bf16.vlgmr.msra.gmra.mrb[100].mxu1 %vm751_vm0, %v4033_v46 }
0x1366   : > { %5014 = vmatprep.mubr.msk.bf16.mxu1 %vm5236_vm1, %v5235_v9  ;;  %5011 = vmatpush3.bf16.msra.mxu1 %v5121_v47 }
0x1367   : > { %5012 = vmatprep.subr.bf16.mxu1 %v5235_v9  ;;  %v4100_v9 = vld [vmem:[%s6203_s23] sm:$0x1] }
0x136a   : > { %5013 = vmatpush3.bf16.msra.mxu1 %v5122_v48 }
0x1438   : > { %v4088_v50 = vpop.f32.mrb[100].mxu1 }
0x1439   : > { %v4089_v51 = vadd.f32 %v4088_v50, %v4038_v49  ;;  %v5008_v44 = vpop.f32.mrb[101].mxu1 }
0x143a   : > { %v4091_v52 = vpop.f32.mrb[102].mxu1 }
0x143b   : > { %5169 = vtanh.f32 %v4089_v51  ;;  %v5009_v53 = vpop.f32.mrb[103].mxu1 }
0x1445   : > { %v5170_v3 = vpop.eup %5169 }
0x1446   : > { %v4095_v54 = vpack.c.bf16 %v5170_v3, %v5170_v3 }
0x1448   : > { %5015 = vmatmul.mubr.msk.bf16.vlgmr.msra.gmra.mrb[104].mxu1 %vm751_vm0, %v4095_v54 }
0x151b   : > { %v4150_v55 = vpop.f32.mrb[104].mxu1 }
0x151c   : > { %v4151_v58 = vadd.f32 %v4150_v55, %v4100_v9  ;;  %v5016_v59 = vpop.f32.mrb[105].mxu1 }
0x151d   : > { %v4153_v60 = vpop.f32.mrb[106].mxu1 }
0x151e   : > { %4156 = vst [vmem:[%s738_s3] sm:$0x1] %v4151_v58  ;;  %v5017_v61 = vpop.f32.mrb[107].mxu1 }
0x151f   : > { %5184 = shalt.err (!%p5181_p3)
}
0x1520   : > { %s5185_s0 = scalar_lea.hbm %s6138_s2, 16  ;;  %s5189_s8 = scalar_lea.hbm %s6252_s1, 32 }
0x1521   : > { %p5186_p4 = scmp.ne.s32.totalorder %s6138_s2, %s5185_s0  ;;  %p5190_p9 = scmp.lt.u32.totalorder %s6138_s2, %s6252_s1 }
0x1522   : > { %p5191_p10 = scmp.lt.u32.totalorder %s5189_s8, %s5185_s0  ;;  %p5193_p12 = scmp.lt.u32.totalorder %s5185_s0, %s6138_s2 }
0x1523   : > { %p5187_p7 = pnand %p5186_p4, %p5401_p5 }
0x1524   : > { %p5192_p11 = por %p5191_p10, %p5190_p9 }
0x1525   : > { %p5188_p8 = pneg %p5187_p7 }
0x1526   : > { %p5194_p13 = por %p5193_p12, %p5192_p11 }
0x1528   : > { %p5195_p0 = pnand %p5194_p13, %p5188_p8 }
0x152a   : > { %5198 = shalt.err (!%p5195_p0)
}
0x152b   : > { %5018 = dma.vmem_to_hbm [thread:$0]  (%p5401_p5), %s6140_s5, 16, %s6138_s2, %s4158_s28  }
0x152c PF: > { %s6253_s6 = sld [smem:[#allocation7_spill]]  ;;  %s6254_s25 = sld [smem:[#allocation5_spill]] }
0x1532   : > { %p5024_p1 = scmp.ge.s32.totalorder %s6253_s6, 2  ;;  %s4182_s3 = sand.u32 1, %s6254_s25  }
0x1533   : > { %s4183_s27 = scalar_lea.sflag [#allocation3], %s4182_s3 }
0x1534   : > { %p5021_p2 = pnand %p5024_p1, %p5405_p6 }
0x1536   : > { %5216 = dma.done.wait (!%p5021_p2), %s4183_s27, 16  }
0x1537   : > { %5218 = vsyncadd (!%p5021_p2), %s4183_s27, 4294967280  ;;  %s6256_s28 = sld [smem:[#allocation8_spill]]  ;;  %s6257_s0 = sld [smem:[#allocation6_spill]] }
0x1538   : > { %s6258_s27 = sld [smem:[#allocation9_spill]]  ;;  %s6259_s5 = smov %s5225_s26 }
0x153d   : > { %p34_p3 = scmp.ge.s32.totalorder %s6256_s28, 4   ;;  %s6260_s26 = smov %s6257_s0 }
0x153f   :  { %36 = sbr.rel (!%p34_p3) target bundleno = 14 (0xe), region = 170 }
0x1546   :  { %4187 = vsyncpa [#allocation3], 1 }
0x1547   :  { %4189 = vsyncpa [#allocation3 + $0x1], 1 }

</bundles_post_ra>
